<compile_context>
chip_gen: v5e
topology: v5e:2x2
jax: 0.10.0
libtpu: 0.0.40
codegen_flags: <defaults>
</compile_context>

<pallas_src>
import functools

import jax
import jax.numpy as jnp
from jax.experimental import pallas as pl
from jax.experimental.pallas import tpu as pltpu

F32 = jnp.float32


# ----------------------------------------------------------------------------
# Small helpers used inside kernels
# ----------------------------------------------------------------------------
def _vspec():
    return pl.BlockSpec(memory_space=pltpu.MemorySpace.VMEM)


def _dot(a, b):
    return jnp.dot(a, b, preferred_element_type=F32)


def _leaky(x):
    return jnp.where(x > 0, x, 0.01 * x)          # nn.LeakyReLU default slope


def _elu(x):
    return jnp.where(x > 0, x, jnp.exp(jnp.minimum(x, 0.0)) - 1.0)


def _edge_softmax(z, D, DT):
    """DGL edge_softmax of (E,1) logits grouped by destination node.

    D: (E, V) one-hot destination incidence, DT = D.T.  No (E, E) mask:
    per-destination max via a masked (E, V) reduce, denominator via
    D @ (D^T @ exp(z - m)).
    """
    hit = D > 0.5
    zb = jnp.broadcast_to(z, D.shape)                                   # (E, V)
    m_v = jnp.max(jnp.where(hit, zb, -jnp.inf), axis=0, keepdims=True)  # (1, V)
    m_e = jnp.sum(jnp.where(hit, m_v, 0.0), axis=1, keepdims=True)      # (E, 1)
    ez = jnp.exp(z - m_e)
    denom = _dot(D, _dot(DT, ez))                                       # (E, 1)
    return ez / denom


def _gru_relu(x, h, wi_ref, wh_ref, bi_ref, bh_ref):
    """ReLU(GRUCell(x, h)); gate params stacked (3, din, dh) in r/z/n order."""
    pre_r = _dot(x, wi_ref[0]) + bi_ref[0] + _dot(h, wh_ref[0]) + bh_ref[0]
    pre_z = _dot(x, wi_ref[1]) + bi_ref[1] + _dot(h, wh_ref[1]) + bh_ref[1]
    i_n = _dot(x, wi_ref[2]) + bi_ref[2]
    h_n = _dot(h, wh_ref[2]) + bh_ref[2]
    r = jax.nn.sigmoid(pre_r)
    u = jax.nn.sigmoid(pre_z)
    n = jnp.tanh(i_n + r * h_n)
    h_new = (1.0 - u) * n + u * h
    return jnp.maximum(h_new, 0.0)


# ----------------------------------------------------------------------------
# Fused kernels
# ----------------------------------------------------------------------------
def _get_context_kernel(nf_ref, ef_ref, S_ref, D_ref, DT_ref,
                        pn_w, pn_b, pe1_wn, pe1_we, pe1_b,
                        pe2_wd, pe2_we, pe2_b, et_w, et_b,
                        gwi, gwh, gbi, gbh, o_ref):
    nf = nf_ref[...]                                    # (V, node_feat)
    ef = ef_ref[...]                                    # (E, edge_feat)
    S = S_ref[...]                                      # (E, V) src one-hot
    D = D_ref[...]                                      # (E, V) dst one-hot
    DT = DT_ref[...]                                    # (V, E)

    # project_node: LeakyReLU(Linear(node_feats))
    hv_new = _leaky(_dot(nf, pn_w[...]) + pn_b[...])                        # (V, gf)
    # project_edge1 on cat([src hv, edge_feats]) -> split-weight dots
    hv_src = _dot(S, nf)                                                    # (E, nf)
    he1 = _leaky(_dot(hv_src, pe1_wn[...]) + _dot(ef, pe1_we[...]) + pe1_b[...])
    # project_edge2 on cat([dst hv_new, he1]) -> (E, 1) logits (never hit HBM)
    hvnew_dst = _dot(D, hv_new)                                             # (E, gf)
    z = _leaky(_dot(hvnew_dst, pe2_wd[...]) + _dot(he1, pe2_we[...]) + pe2_b[...])
    a = _edge_softmax(z, D, DT)
    # AttentiveGRU1: e = softmax * edge_transform(he1); c = scatter-sum to dst
    e_msg = a * (_dot(he1, et_w[...]) + et_b[...])                          # (E, gf)
    c = _dot(DT, e_msg)                                                     # (V, gf)
    o_ref[...] = _gru_relu(_elu(c), hv_new, gwi, gwh, gbi, gbh)


def _gnn_layer_kernel(nf_ref, acc_ref, S_ref, D_ref, DT_ref,
                      pe_wd, pe_ws, pe_b, pn_w, pn_b,
                      gwi, gwh, gbi, gbh, bn_s, bn_t,
                      onf_ref, oacc_ref):
    nf = nf_ref[...]                                    # (V, gf)
    S = S_ref[...]
    D = D_ref[...]
    DT = DT_ref[...]

    # project_edge on cat([hv_dst, hv_src]) -> split-weight dots -> (E, 1)
    hv_dst = _dot(D, nf)
    hv_src = _dot(S, nf)
    z = _leaky(_dot(hv_dst, pe_wd[...]) + _dot(hv_src, pe_ws[...]) + pe_b[...])
    a = _edge_softmax(z, D, DT)
    # AttentiveGRU2: project node, src_mul_edge, sum to dst, ELU, GRU, ReLU
    hv_proj = _dot(nf, pn_w[...]) + pn_b[...]                               # (V, gf)
    msg = _dot(S, hv_proj) * a                                              # (E, gf)
    c = _dot(DT, msg)                                                       # (V, gf)
    h_new = _gru_relu(_elu(c), nf, gwi, gwh, gbi, gbh)
    # folded eval-mode BatchNorm1d
    nf_new = h_new * bn_s[...] + bn_t[...]
    onf_ref[...] = nf_new
    oacc_ref[...] = acc_ref[...] + nf_new               # running sum for predict


def _predict_kernel(acc_ref, w_ref, b_ref, o_ref, *, inv_n):
    # mean over layers of Linear(nf_l) == Linear(sum_l nf_l) / n  (bias kept)
    o_ref[...] = _dot(acc_ref[...], w_ref[...]) * inv_n + b_ref[...]


# ----------------------------------------------------------------------------
# pallas_call wrappers
# ----------------------------------------------------------------------------
def get_context(node_feats, edge_feats, graph, p):
    V = node_feats.shape[0]
    gf = p["pn_w"].shape[1]
    args = (node_feats, edge_feats, graph["S"], graph["D"], graph["DT"],
            p["pn_w"], p["pn_b"], p["pe1_wn"], p["pe1_we"], p["pe1_b"],
            p["pe2_wd"], p["pe2_we"], p["pe2_b"], p["et_w"], p["et_b"],
            p["gru_wi"], p["gru_wh"], p["gru_bi"], p["gru_bh"])
    return pl.pallas_call(
        _get_context_kernel,
        out_shape=jax.ShapeDtypeStruct((V, gf), F32),
        in_specs=[_vspec()] * len(args),
        out_specs=_vspec(),
    )(*args)


def gnn_layer(nf, acc, graph, p):
    V, gf = nf.shape
    args = (nf, acc, graph["S"], graph["D"], graph["DT"],
            p["pe_wd"], p["pe_ws"], p["pe_b"], p["pn_w"], p["pn_b"],
            p["gru_wi"], p["gru_wh"], p["gru_bi"], p["gru_bh"],
            p["bn_scale"], p["bn_shift"])
    return pl.pallas_call(
        _gnn_layer_kernel,
        out_shape=(jax.ShapeDtypeStruct((V, gf), F32),
                   jax.ShapeDtypeStruct((V, gf), F32)),
        in_specs=[_vspec()] * len(args),
        out_specs=(_vspec(), _vspec()),
    )(*args)


def predict_mean(acc, w, b, n_gnn_layers):
    V = acc.shape[0]
    return pl.pallas_call(
        functools.partial(_predict_kernel, inv_n=1.0 / float(n_gnn_layers)),
        out_shape=jax.ShapeDtypeStruct((V, 1), F32),
        in_specs=[_vspec()] * 3,
        out_specs=_vspec(),
    )(acc, w, b)


def attentive_fp_forward(params, graph, node_feats, edge_feats):
    """ModifiedAttentiveFPGNNV3.forward (eval semantics)."""
    nf = get_context(node_feats, edge_feats, graph, params["gc"])
    acc = jnp.zeros_like(nf)
    for lp in params["gnn_layers"]:
        nf, acc = gnn_layer(nf, acc, graph, lp)
    return predict_mean(acc, params["pred_w"], params["pred_b"],
                        len(params["gnn_layers"]))


# ----------------------------------------------------------------------------
# Parameters (deterministic, synthetic) and synthetic batched graph
# ----------------------------------------------------------------------------
def _randn(key, shape, scale=0.2):
    return scale * jax.random.normal(key, shape, F32)


def _gru_params(key, din, dh):
    k = jax.random.split(key, 4)
    return {"gru_wi": _randn(k[0], (3, din, dh)),   # r / z / n gates
            "gru_wh": _randn(k[1], (3, dh, dh)),
            "gru_bi": _randn(k[2], (3, 1, dh)),
            "gru_bh": _randn(k[3], (3, 1, dh))}


def _bn_folded(key, d, eps=1e-5):
    k1, k2 = jax.random.split(key)
    gamma = 1.0 + 0.1 * jax.random.normal(k1, (1, d), F32)
    beta = 0.1 * jax.random.normal(k2, (1, d), F32)
    mean = jnp.zeros((1, d), F32)       # running stats at init (eval mode)
    var = jnp.ones((1, d), F32)
    scale = gamma * jax.lax.rsqrt(var + eps)
    return {"bn_scale": scale, "bn_shift": beta - mean * scale}


def init_params(key, node_feat, edge_feat, num_layers, graph_feat):
    keys = iter(jax.random.split(key, 64))
    gc = {
        "pn_w": _randn(next(keys), (node_feat, graph_feat)),
        "pn_b": _randn(next(keys), (1, graph_feat)),
        # project_edge1 weight split for cat([hv_src, edge_feats])
        "pe1_wn": _randn(next(keys), (node_feat, graph_feat)),
        "pe1_we": _randn(next(keys), (edge_feat, graph_feat)),
        "pe1_b": _randn(next(keys), (1, graph_feat)),
        # project_edge2 weight split for cat([hv_new_dst, he1])
        "pe2_wd": _randn(next(keys), (graph_feat, 1)),
        "pe2_we": _randn(next(keys), (graph_feat, 1)),
        "pe2_b": _randn(next(keys), (1, 1)),
        # AttentiveGRU1.edge_transform
        "et_w": _randn(next(keys), (graph_feat, graph_feat)),
        "et_b": _randn(next(keys), (1, graph_feat)),
    }
    gc.update(_gru_params(next(keys), graph_feat, graph_feat))

    layers = []
    for _ in range(num_layers - 1):
        lp = {
            # project_edge weight split for cat([hv_dst, hv_src])
            "pe_wd": _randn(next(keys), (graph_feat, 1)),
            "pe_ws": _randn(next(keys), (graph_feat, 1)),
            "pe_b": _randn(next(keys), (1, 1)),
            # AttentiveGRU2.project_node
            "pn_w": _randn(next(keys), (graph_feat, graph_feat)),
            "pn_b": _randn(next(keys), (1, graph_feat)),
        }
        lp.update(_gru_params(next(keys), graph_feat, graph_feat))
        lp.update(_bn_folded(next(keys), graph_feat))
        layers.append(lp)

    return {"gc": gc, "gnn_layers": layers,
            "pred_w": _randn(next(keys), (graph_feat, 1)),
            "pred_b": _randn(next(keys), (1, 1))}


def build_ring_edges(n_per, n_graphs, offsets=(1,)):
    src, dst = [], []
    for gidx in range(n_graphs):
        base = gidx * n_per
        for i in range(n_per):
            for off in offsets:
                src.append(base + i)
                dst.append(base + (i + off) % n_per)
                src.append(base + (i + off) % n_per)
                dst.append(base + i)
    return jnp.array(src, jnp.int32), jnp.array(dst, jnp.int32)


def build_graph(src, dst, n_nodes):
    S = jax.nn.one_hot(src, n_nodes, dtype=F32)    # (E, V) source incidence
    D = jax.nn.one_hot(dst, n_nodes, dtype=F32)    # (E, V) destination incidence
    return {"S": S, "D": D, "DT": D.T}


# ----------------------------------------------------------------------------
# Demo / smoke test
# ----------------------------------------------------------------------------
if __name__ == "__main__":
    NODE_FEAT, EDGE_FEAT = 16, 8
    NUM_LAYERS, GRAPH_FEAT = 2, 32
    N_GRAPHS, N_PER = 2, 6
    V = N_GRAPHS * N_PER

    key = jax.random.PRNGKey(0)
    k_param, k_nf, k_ef = jax.random.split(key, 3)

    src, dst = build_ring_edges(N_PER, N_GRAPHS, offsets=(1,))
    graph = build_graph(src, dst, V)
    E = int(src.shape[0])

    node_feats = jax.random.normal(k_nf, (V, NODE_FEAT), F32)
    edge_feats = jax.random.normal(k_ef, (E, EDGE_FEAT), F32)

    params = init_params(k_param, NODE_FEAT, EDGE_FEAT, NUM_LAYERS, GRAPH_FEAT)

    out = jax.jit(attentive_fp_forward)(params, graph, node_feats, edge_feats)
    out = jax.block_until_ready(out)
    assert out.shape == (V, 1)
    assert bool(jnp.all(jnp.isfinite(out)))
    print("KERNEL_OK")
</pallas_src>

<mosaic_0001>
module attributes {stable_mosaic.version = 11 : i64} {
  func.func @_get_context_kernel(%arg0: memref<12x16xf32, #tpu.memory_space<vmem>>, %arg1: memref<24x8xf32, #tpu.memory_space<vmem>>, %arg2: memref<24x12xf32, #tpu.memory_space<vmem>>, %arg3: memref<24x12xf32, #tpu.memory_space<vmem>>, %arg4: memref<12x24xf32, #tpu.memory_space<vmem>>, %arg5: memref<16x32xf32, #tpu.memory_space<vmem>>, %arg6: memref<1x32xf32, #tpu.memory_space<vmem>>, %arg7: memref<16x32xf32, #tpu.memory_space<vmem>>, %arg8: memref<8x32xf32, #tpu.memory_space<vmem>>, %arg9: memref<1x32xf32, #tpu.memory_space<vmem>>, %arg10: memref<32x1xf32, #tpu.memory_space<vmem>>, %arg11: memref<32x1xf32, #tpu.memory_space<vmem>>, %arg12: memref<1x1xf32, #tpu.memory_space<vmem>>, %arg13: memref<32x32xf32, #tpu.memory_space<vmem>>, %arg14: memref<1x32xf32, #tpu.memory_space<vmem>>, %arg15: memref<3x32x32xf32, #tpu.memory_space<vmem>>, %arg16: memref<3x32x32xf32, #tpu.memory_space<vmem>>, %arg17: memref<3x1x32xf32, #tpu.memory_space<vmem>>, %arg18: memref<3x1x32xf32, #tpu.memory_space<vmem>>, %arg19: memref<12x32xf32, #tpu.memory_space<vmem>>) attributes {dimension_semantics = [], scalar_prefetch = 0 : i64, scratch_operands = 0 : i64, tpu.core_type = #tpu.core_type<tc>} {
    %c0 = arith.constant 0 : index
    %c0_0 = arith.constant 0 : index
    %0 = vector.load %arg0[%c0, %c0_0] : memref<12x16xf32, #tpu.memory_space<vmem>>, vector<12x16xf32>
    %c0_1 = arith.constant 0 : index
    %c0_2 = arith.constant 0 : index
    %1 = vector.load %arg1[%c0_1, %c0_2] : memref<24x8xf32, #tpu.memory_space<vmem>>, vector<24x8xf32>
    %c0_3 = arith.constant 0 : index
    %c0_4 = arith.constant 0 : index
    %2 = vector.load %arg2[%c0_3, %c0_4] : memref<24x12xf32, #tpu.memory_space<vmem>>, vector<24x12xf32>
    %c0_5 = arith.constant 0 : index
    %c0_6 = arith.constant 0 : index
    %3 = vector.load %arg3[%c0_5, %c0_6] : memref<24x12xf32, #tpu.memory_space<vmem>>, vector<24x12xf32>
    %c0_7 = arith.constant 0 : index
    %c0_8 = arith.constant 0 : index
    %4 = vector.load %arg4[%c0_7, %c0_8] : memref<12x24xf32, #tpu.memory_space<vmem>>, vector<12x24xf32>
    %c0_9 = arith.constant 0 : index
    %c0_10 = arith.constant 0 : index
    %5 = vector.load %arg5[%c0_9, %c0_10] : memref<16x32xf32, #tpu.memory_space<vmem>>, vector<16x32xf32>
    %cst = arith.constant dense<0.000000e+00> : vector<12x32xf32>
    %6 = tpu.matmul %0, %5, %cst {dimension_numbers = #tpu.dot_dimension_numbers<[1], [0], [0], [1], [0, 0, 1, 1], [], []>} : vector<12x16xf32>, vector<16x32xf32>, vector<12x32xf32> -> vector<12x32xf32>
    %c0_11 = arith.constant 0 : index
    %c0_12 = arith.constant 0 : index
    %7 = vector.load %arg6[%c0_11, %c0_12] : memref<1x32xf32, #tpu.memory_space<vmem>>, vector<1x32xf32>
    %8 = vector.broadcast %7 : vector<1x32xf32> to vector<12x32xf32>
    %9 = arith.addf %6, %8 : vector<12x32xf32>
    %cst_13 = arith.constant 0.000000e+00 : f32
    %10 = vector.broadcast %cst_13 : f32 to vector<12x32xf32>
    %11 = arith.cmpf ogt, %9, %10 : vector<12x32xf32>
    %cst_14 = arith.constant 0.00999999977 : f32
    %12 = vector.broadcast %cst_14 : f32 to vector<12x32xf32>
    %13 = arith.mulf %12, %9 : vector<12x32xf32>
    %14 = arith.select %11, %9, %13 : vector<12x32xi1>, vector<12x32xf32>
    %cst_15 = arith.constant dense<0.000000e+00> : vector<24x16xf32>
    %15 = tpu.matmul %2, %0, %cst_15 {dimension_numbers = #tpu.dot_dimension_numbers<[1], [0], [0], [1], [0, 0, 1, 1], [], []>} : vector<24x12xf32>, vector<12x16xf32>, vector<24x16xf32> -> vector<24x16xf32>
    %c0_16 = arith.constant 0 : index
    %c0_17 = arith.constant 0 : index
    %16 = vector.load %arg7[%c0_16, %c0_17] : memref<16x32xf32, #tpu.memory_space<vmem>>, vector<16x32xf32>
    %cst_18 = arith.constant dense<0.000000e+00> : vector<24x32xf32>
    %17 = tpu.matmul %15, %16, %cst_18 {dimension_numbers = #tpu.dot_dimension_numbers<[1], [0], [0], [1], [0, 0, 1, 1], [], []>} : vector<24x16xf32>, vector<16x32xf32>, vector<24x32xf32> -> vector<24x32xf32>
    %c0_19 = arith.constant 0 : index
    %c0_20 = arith.constant 0 : index
    %18 = vector.load %arg8[%c0_19, %c0_20] : memref<8x32xf32, #tpu.memory_space<vmem>>, vector<8x32xf32>
    %cst_21 = arith.constant dense<0.000000e+00> : vector<24x32xf32>
    %19 = tpu.matmul %1, %18, %cst_21 {dimension_numbers = #tpu.dot_dimension_numbers<[1], [0], [0], [1], [0, 0, 1, 1], [], []>} : vector<24x8xf32>, vector<8x32xf32>, vector<24x32xf32> -> vector<24x32xf32>
    %20 = arith.addf %17, %19 : vector<24x32xf32>
    %c0_22 = arith.constant 0 : index
    %c0_23 = arith.constant 0 : index
    %21 = vector.load %arg9[%c0_22, %c0_23] : memref<1x32xf32, #tpu.memory_space<vmem>>, vector<1x32xf32>
    %22 = vector.broadcast %21 : vector<1x32xf32> to vector<24x32xf32>
    %23 = arith.addf %20, %22 : vector<24x32xf32>
    %cst_24 = arith.constant 0.000000e+00 : f32
    %24 = vector.broadcast %cst_24 : f32 to vector<24x32xf32>
    %25 = arith.cmpf ogt, %23, %24 : vector<24x32xf32>
    %cst_25 = arith.constant 0.00999999977 : f32
    %26 = vector.broadcast %cst_25 : f32 to vector<24x32xf32>
    %27 = arith.mulf %26, %23 : vector<24x32xf32>
    %28 = arith.select %25, %23, %27 : vector<24x32xi1>, vector<24x32xf32>
    %cst_26 = arith.constant dense<0.000000e+00> : vector<24x32xf32>
    %29 = tpu.matmul %3, %14, %cst_26 {dimension_numbers = #tpu.dot_dimension_numbers<[1], [0], [0], [1], [0, 0, 1, 1], [], []>} : vector<24x12xf32>, vector<12x32xf32>, vector<24x32xf32> -> vector<24x32xf32>
    %c0_27 = arith.constant 0 : index
    %c0_28 = arith.constant 0 : index
    %30 = vector.load %arg10[%c0_27, %c0_28] : memref<32x1xf32, #tpu.memory_space<vmem>>, vector<32x1xf32>
    %cst_29 = arith.constant dense<0.000000e+00> : vector<24x1xf32>
    %31 = tpu.matmul %29, %30, %cst_29 {dimension_numbers = #tpu.dot_dimension_numbers<[1], [0], [0], [1], [0, 0, 1, 1], [], []>} : vector<24x32xf32>, vector<32x1xf32>, vector<24x1xf32> -> vector<24x1xf32>
    %c0_30 = arith.constant 0 : index
    %c0_31 = arith.constant 0 : index
    %32 = vector.load %arg11[%c0_30, %c0_31] : memref<32x1xf32, #tpu.memory_space<vmem>>, vector<32x1xf32>
    %cst_32 = arith.constant dense<0.000000e+00> : vector<24x1xf32>
    %33 = tpu.matmul %28, %32, %cst_32 {dimension_numbers = #tpu.dot_dimension_numbers<[1], [0], [0], [1], [0, 0, 1, 1], [], []>} : vector<24x32xf32>, vector<32x1xf32>, vector<24x1xf32> -> vector<24x1xf32>
    %34 = arith.addf %31, %33 : vector<24x1xf32>
    %c0_33 = arith.constant 0 : index
    %c0_34 = arith.constant 0 : index
    %35 = vector.load %arg12[%c0_33, %c0_34] : memref<1x1xf32, #tpu.memory_space<vmem>>, vector<1x1xf32>
    %36 = vector.broadcast %35 : vector<1x1xf32> to vector<24x1xf32>
    %37 = arith.addf %34, %36 : vector<24x1xf32>
    %cst_35 = arith.constant 0.000000e+00 : f32
    %38 = vector.broadcast %cst_35 : f32 to vector<24x1xf32>
    %39 = arith.cmpf ogt, %37, %38 : vector<24x1xf32>
    %cst_36 = arith.constant 0.00999999977 : f32
    %40 = vector.broadcast %cst_36 : f32 to vector<24x1xf32>
    %41 = arith.mulf %40, %37 : vector<24x1xf32>
    %42 = arith.select %39, %37, %41 : vector<24x1xi1>, vector<24x1xf32>
    %cst_37 = arith.constant 5.000000e-01 : f32
    %43 = vector.broadcast %cst_37 : f32 to vector<24x12xf32>
    %44 = arith.cmpf ogt, %3, %43 : vector<24x12xf32>
    %45 = vector.shape_cast %42 : vector<24x1xf32> to vector<24x1xf32>
    %46 = vector.broadcast %45 : vector<24x1xf32> to vector<24x12xf32>
    %cst_38 = arith.constant 0xFF800000 : f32
    %47 = vector.broadcast %cst_38 : f32 to vector<24x12xf32>
    %48 = arith.select %44, %46, %47 : vector<24x12xi1>, vector<24x12xf32>
    %cst_39 = arith.constant dense<0xFF800000> : vector<12xf32>
    %49 = vector.multi_reduction <maximumf>, %48, %cst_39 [0] : vector<24x12xf32> to vector<12xf32>
    %50 = vector.shape_cast %49 : vector<12xf32> to vector<1x12xf32>
    %cst_40 = arith.constant 0.000000e+00 : f32
    %51 = vector.shape_cast %50 : vector<1x12xf32> to vector<1x12xf32>
    %52 = vector.broadcast %51 : vector<1x12xf32> to vector<24x12xf32>
    %53 = vector.broadcast %cst_40 : f32 to vector<24x12xf32>
    %54 = arith.select %44, %52, %53 : vector<24x12xi1>, vector<24x12xf32>
    %cst_41 = arith.constant dense<0.000000e+00> : vector<24xf32>
    %55 = vector.multi_reduction <add>, %54, %cst_41 [1] : vector<24x12xf32> to vector<24xf32>
    %56 = vector.shape_cast %55 : vector<24xf32> to vector<24x1xf32>
    %57 = arith.subf %42, %56 : vector<24x1xf32>
    %58 = math.exp %57 : vector<24x1xf32>
    %cst_42 = arith.constant dense<0.000000e+00> : vector<12x1xf32>
    %59 = tpu.matmul %4, %58, %cst_42 {dimension_numbers = #tpu.dot_dimension_numbers<[1], [0], [0], [1], [0, 0, 1, 1], [], []>} : vector<12x24xf32>, vector<24x1xf32>, vector<12x1xf32> -> vector<12x1xf32>
    %cst_43 = arith.constant dense<0.000000e+00> : vector<24x1xf32>
    %60 = tpu.matmul %3, %59, %cst_43 {dimension_numbers = #tpu.dot_dimension_numbers<[1], [0], [0], [1], [0, 0, 1, 1], [], []>} : vector<24x12xf32>, vector<12x1xf32>, vector<24x1xf32> -> vector<24x1xf32>
    %61 = arith.divf %58, %60 : vector<24x1xf32>
    %c0_44 = arith.constant 0 : index
    %c0_45 = arith.constant 0 : index
    %62 = vector.load %arg13[%c0_44, %c0_45] : memref<32x32xf32, #tpu.memory_space<vmem>>, vector<32x32xf32>
    %cst_46 = arith.constant dense<0.000000e+00> : vector<24x32xf32>
    %63 = tpu.matmul %28, %62, %cst_46 {dimension_numbers = #tpu.dot_dimension_numbers<[1], [0], [0], [1], [0, 0, 1, 1], [], []>} : vector<24x32xf32>, vector<32x32xf32>, vector<24x32xf32> -> vector<24x32xf32>
    %c0_47 = arith.constant 0 : index
    %c0_48 = arith.constant 0 : index
    %64 = vector.load %arg14[%c0_47, %c0_48] : memref<1x32xf32, #tpu.memory_space<vmem>>, vector<1x32xf32>
    %65 = vector.broadcast %64 : vector<1x32xf32> to vector<24x32xf32>
    %66 = arith.addf %63, %65 : vector<24x32xf32>
    %67 = vector.broadcast %61 : vector<24x1xf32> to vector<24x32xf32>
    %68 = arith.mulf %67, %66 : vector<24x32xf32>
    %cst_49 = arith.constant dense<0.000000e+00> : vector<12x32xf32>
    %69 = tpu.matmul %4, %68, %cst_49 {dimension_numbers = #tpu.dot_dimension_numbers<[1], [0], [0], [1], [0, 0, 1, 1], [], []>} : vector<12x24xf32>, vector<24x32xf32>, vector<12x32xf32> -> vector<12x32xf32>
    %cst_50 = arith.constant 0.000000e+00 : f32
    %70 = vector.broadcast %cst_50 : f32 to vector<12x32xf32>
    %71 = arith.cmpf ogt, %69, %70 : vector<12x32xf32>
    %cst_51 = arith.constant 0.000000e+00 : f32
    %72 = vector.broadcast %cst_51 : f32 to vector<12x32xf32>
    %73 = arith.minimumf %69, %72 : vector<12x32xf32>
    %74 = math.exp %73 : vector<12x32xf32>
    %cst_52 = arith.constant 1.000000e+00 : f32
    %75 = vector.broadcast %cst_52 : f32 to vector<12x32xf32>
    %76 = arith.subf %74, %75 : vector<12x32xf32>
    %77 = arith.select %71, %69, %76 : vector<12x32xi1>, vector<12x32xf32>
    %c0_53 = arith.constant 0 : index
    %c0_54 = arith.constant 0 : index
    %c0_55 = arith.constant 0 : index
    %78 = vector.load %arg15[%c0_53, %c0_54, %c0_55] : memref<3x32x32xf32, #tpu.memory_space<vmem>>, vector<1x32x32xf32>
    %79 = vector.shape_cast %78 : vector<1x32x32xf32> to vector<32x32xf32>
    %cst_56 = arith.constant dense<0.000000e+00> : vector<12x32xf32>
    %80 = tpu.matmul %77, %79, %cst_56 {dimension_numbers = #tpu.dot_dimension_numbers<[1], [0], [0], [1], [0, 0, 1, 1], [], []>} : vector<12x32xf32>, vector<32x32xf32>, vector<12x32xf32> -> vector<12x32xf32>
    %c0_57 = arith.constant 0 : index
    %c0_58 = arith.constant 0 : index
    %c0_59 = arith.constant 0 : index
    %81 = vector.load %arg17[%c0_57, %c0_58, %c0_59] : memref<3x1x32xf32, #tpu.memory_space<vmem>>, vector<1x1x32xf32>
    %82 = vector.shape_cast %81 : vector<1x1x32xf32> to vector<1x32xf32>
    %83 = vector.broadcast %82 : vector<1x32xf32> to vector<12x32xf32>
    %84 = arith.addf %80, %83 : vector<12x32xf32>
    %c0_60 = arith.constant 0 : index
    %c0_61 = arith.constant 0 : index
    %c0_62 = arith.constant 0 : index
    %85 = vector.load %arg16[%c0_60, %c0_61, %c0_62] : memref<3x32x32xf32, #tpu.memory_space<vmem>>, vector<1x32x32xf32>
    %86 = vector.shape_cast %85 : vector<1x32x32xf32> to vector<32x32xf32>
    %cst_63 = arith.constant dense<0.000000e+00> : vector<12x32xf32>
    %87 = tpu.matmul %14, %86, %cst_63 {dimension_numbers = #tpu.dot_dimension_numbers<[1], [0], [0], [1], [0, 0, 1, 1], [], []>} : vector<12x32xf32>, vector<32x32xf32>, vector<12x32xf32> -> vector<12x32xf32>
    %88 = arith.addf %84, %87 : vector<12x32xf32>
    %c0_64 = arith.constant 0 : index
    %c0_65 = arith.constant 0 : index
    %c0_66 = arith.constant 0 : index
    %89 = vector.load %arg18[%c0_64, %c0_65, %c0_66] : memref<3x1x32xf32, #tpu.memory_space<vmem>>, vector<1x1x32xf32>
    %90 = vector.shape_cast %89 : vector<1x1x32xf32> to vector<1x32xf32>
    %91 = vector.broadcast %90 : vector<1x32xf32> to vector<12x32xf32>
    %92 = arith.addf %88, %91 : vector<12x32xf32>
    %c1 = arith.constant 1 : index
    %c0_67 = arith.constant 0 : index
    %c0_68 = arith.constant 0 : index
    %93 = vector.load %arg15[%c1, %c0_67, %c0_68] : memref<3x32x32xf32, #tpu.memory_space<vmem>>, vector<1x32x32xf32>
    %94 = vector.shape_cast %93 : vector<1x32x32xf32> to vector<32x32xf32>
    %cst_69 = arith.constant dense<0.000000e+00> : vector<12x32xf32>
    %95 = tpu.matmul %77, %94, %cst_69 {dimension_numbers = #tpu.dot_dimension_numbers<[1], [0], [0], [1], [0, 0, 1, 1], [], []>} : vector<12x32xf32>, vector<32x32xf32>, vector<12x32xf32> -> vector<12x32xf32>
    %c1_70 = arith.constant 1 : index
    %c0_71 = arith.constant 0 : index
    %c0_72 = arith.constant 0 : index
    %96 = vector.load %arg17[%c1_70, %c0_71, %c0_72] : memref<3x1x32xf32, #tpu.memory_space<vmem>>, vector<1x1x32xf32>
    %97 = vector.shape_cast %96 : vector<1x1x32xf32> to vector<1x32xf32>
    %98 = vector.broadcast %97 : vector<1x32xf32> to vector<12x32xf32>
    %99 = arith.addf %95, %98 : vector<12x32xf32>
    %c1_73 = arith.constant 1 : index
    %c0_74 = arith.constant 0 : index
    %c0_75 = arith.constant 0 : index
    %100 = vector.load %arg16[%c1_73, %c0_74, %c0_75] : memref<3x32x32xf32, #tpu.memory_space<vmem>>, vector<1x32x32xf32>
    %101 = vector.shape_cast %100 : vector<1x32x32xf32> to vector<32x32xf32>
    %cst_76 = arith.constant dense<0.000000e+00> : vector<12x32xf32>
    %102 = tpu.matmul %14, %101, %cst_76 {dimension_numbers = #tpu.dot_dimension_numbers<[1], [0], [0], [1], [0, 0, 1, 1], [], []>} : vector<12x32xf32>, vector<32x32xf32>, vector<12x32xf32> -> vector<12x32xf32>
    %103 = arith.addf %99, %102 : vector<12x32xf32>
    %c1_77 = arith.constant 1 : index
    %c0_78 = arith.constant 0 : index
    %c0_79 = arith.constant 0 : index
    %104 = vector.load %arg18[%c1_77, %c0_78, %c0_79] : memref<3x1x32xf32, #tpu.memory_space<vmem>>, vector<1x1x32xf32>
    %105 = vector.shape_cast %104 : vector<1x1x32xf32> to vector<1x32xf32>
    %106 = vector.broadcast %105 : vector<1x32xf32> to vector<12x32xf32>
    %107 = arith.addf %103, %106 : vector<12x32xf32>
    %c2 = arith.constant 2 : index
    %c0_80 = arith.constant 0 : index
    %c0_81 = arith.constant 0 : index
    %108 = vector.load %arg15[%c2, %c0_80, %c0_81] : memref<3x32x32xf32, #tpu.memory_space<vmem>>, vector<1x32x32xf32>
    %109 = vector.shape_cast %108 : vector<1x32x32xf32> to vector<32x32xf32>
    %cst_82 = arith.constant dense<0.000000e+00> : vector<12x32xf32>
    %110 = tpu.matmul %77, %109, %cst_82 {dimension_numbers = #tpu.dot_dimension_numbers<[1], [0], [0], [1], [0, 0, 1, 1], [], []>} : vector<12x32xf32>, vector<32x32xf32>, vector<12x32xf32> -> vector<12x32xf32>
    %c2_83 = arith.constant 2 : index
    %c0_84 = arith.constant 0 : index
    %c0_85 = arith.constant 0 : index
    %111 = vector.load %arg17[%c2_83, %c0_84, %c0_85] : memref<3x1x32xf32, #tpu.memory_space<vmem>>, vector<1x1x32xf32>
    %112 = vector.shape_cast %111 : vector<1x1x32xf32> to vector<1x32xf32>
    %113 = vector.broadcast %112 : vector<1x32xf32> to vector<12x32xf32>
    %114 = arith.addf %110, %113 : vector<12x32xf32>
    %c2_86 = arith.constant 2 : index
    %c0_87 = arith.constant 0 : index
    %c0_88 = arith.constant 0 : index
    %115 = vector.load %arg16[%c2_86, %c0_87, %c0_88] : memref<3x32x32xf32, #tpu.memory_space<vmem>>, vector<1x32x32xf32>
    %116 = vector.shape_cast %115 : vector<1x32x32xf32> to vector<32x32xf32>
    %cst_89 = arith.constant dense<0.000000e+00> : vector<12x32xf32>
    %117 = tpu.matmul %14, %116, %cst_89 {dimension_numbers = #tpu.dot_dimension_numbers<[1], [0], [0], [1], [0, 0, 1, 1], [], []>} : vector<12x32xf32>, vector<32x32xf32>, vector<12x32xf32> -> vector<12x32xf32>
    %c2_90 = arith.constant 2 : index
    %c0_91 = arith.constant 0 : index
    %c0_92 = arith.constant 0 : index
    %118 = vector.load %arg18[%c2_90, %c0_91, %c0_92] : memref<3x1x32xf32, #tpu.memory_space<vmem>>, vector<1x1x32xf32>
    %119 = vector.shape_cast %118 : vector<1x1x32xf32> to vector<1x32xf32>
    %120 = vector.broadcast %119 : vector<1x32xf32> to vector<12x32xf32>
    %121 = arith.addf %117, %120 : vector<12x32xf32>
    %122 = arith.negf %92 : vector<12x32xf32>
    %123 = math.exp %122 : vector<12x32xf32>
    %cst_93 = arith.constant 1.000000e+00 : f32
    %124 = vector.broadcast %cst_93 : f32 to vector<12x32xf32>
    %125 = arith.addf %124, %123 : vector<12x32xf32>
    %126 = arith.divf %124, %125 : vector<12x32xf32>
    %127 = arith.negf %107 : vector<12x32xf32>
    %128 = math.exp %127 : vector<12x32xf32>
    %cst_94 = arith.constant 1.000000e+00 : f32
    %129 = vector.broadcast %cst_94 : f32 to vector<12x32xf32>
    %130 = arith.addf %129, %128 : vector<12x32xf32>
    %131 = arith.divf %129, %130 : vector<12x32xf32>
    %132 = arith.mulf %126, %121 : vector<12x32xf32>
    %133 = arith.addf %114, %132 : vector<12x32xf32>
    %134 = math.tanh %133 : vector<12x32xf32>
    %cst_95 = arith.constant 1.000000e+00 : f32
    %135 = vector.broadcast %cst_95 : f32 to vector<12x32xf32>
    %136 = arith.subf %135, %131 : vector<12x32xf32>
    %137 = arith.mulf %136, %134 : vector<12x32xf32>
    %138 = arith.mulf %131, %14 : vector<12x32xf32>
    %139 = arith.addf %137, %138 : vector<12x32xf32>
    %cst_96 = arith.constant 0.000000e+00 : f32
    %140 = vector.broadcast %cst_96 : f32 to vector<12x32xf32>
    %141 = arith.maximumf %139, %140 : vector<12x32xf32>
    %c0_97 = arith.constant 0 : index
    %c0_98 = arith.constant 0 : index
    %142 = vector.load %arg19[%c0_97, %c0_98] : memref<12x32xf32, #tpu.memory_space<vmem>>, vector<12x32xf32>
    tpu.vector_store %arg19[%c0_97, %c0_98], %141 {strides = array<i32>} : memref<12x32xf32, #tpu.memory_space<vmem>>, vector<12x32xf32>,
    return
  }
}

module attributes {stable_mosaic.version = 11 : i64} {
  func.func @_predict_kernel(%arg0: memref<12x32xf32, #tpu.memory_space<vmem>>, %arg1: memref<32x1xf32, #tpu.memory_space<vmem>>, %arg2: memref<1x1xf32, #tpu.memory_space<vmem>>, %arg3: memref<12x1xf32, #tpu.memory_space<vmem>>) attributes {dimension_semantics = [], scalar_prefetch = 0 : i64, scratch_operands = 0 : i64, tpu.core_type = #tpu.core_type<tc>} {
    %c0 = arith.constant 0 : index
    %c0_0 = arith.constant 0 : index
    %0 = vector.load %arg0[%c0, %c0_0] : memref<12x32xf32, #tpu.memory_space<vmem>>, vector<12x32xf32>
    %c0_1 = arith.constant 0 : index
    %c0_2 = arith.constant 0 : index
    %1 = vector.load %arg1[%c0_1, %c0_2] : memref<32x1xf32, #tpu.memory_space<vmem>>, vector<32x1xf32>
    %cst = arith.constant dense<0.000000e+00> : vector<12x1xf32>
    %2 = tpu.matmul %0, %1, %cst {dimension_numbers = #tpu.dot_dimension_numbers<[1], [0], [0], [1], [0, 0, 1, 1], [], []>} : vector<12x32xf32>, vector<32x1xf32>, vector<12x1xf32> -> vector<12x1xf32>
    %cst_3 = arith.constant 1.000000e+00 : f32
    %3 = vector.broadcast %cst_3 : f32 to vector<12x1xf32>
    %4 = arith.mulf %2, %3 : vector<12x1xf32>
    %c0_4 = arith.constant 0 : index
    %c0_5 = arith.constant 0 : index
    %5 = vector.load %arg2[%c0_4, %c0_5] : memref<1x1xf32, #tpu.memory_space<vmem>>, vector<1x1xf32>
    %6 = vector.broadcast %5 : vector<1x1xf32> to vector<12x1xf32>
    %7 = arith.addf %4, %6 : vector<12x1xf32>
    %c0_6 = arith.constant 0 : index
    %c0_7 = arith.constant 0 : index
    %8 = vector.load %arg3[%c0_6, %c0_7] : memref<12x1xf32, #tpu.memory_space<vmem>>, vector<12x1xf32>
    tpu.vector_store %arg3[%c0_6, %c0_7], %7 {strides = array<i32>} : memref<12x1xf32, #tpu.memory_space<vmem>>, vector<12x1xf32>,
    return
  }
}

module attributes {stable_mosaic.version = 11 : i64} {
  func.func @_gnn_layer_kernel(%arg0: memref<12x32xf32, #tpu.memory_space<vmem>>, %arg1: memref<12x32xf32, #tpu.memory_space<vmem>>, %arg2: memref<24x12xf32, #tpu.memory_space<vmem>>, %arg3: memref<24x12xf32, #tpu.memory_space<vmem>>, %arg4: memref<12x24xf32, #tpu.memory_space<vmem>>, %arg5: memref<32x1xf32, #tpu.memory_space<vmem>>, %arg6: memref<32x1xf32, #tpu.memory_space<vmem>>, %arg7: memref<1x1xf32, #tpu.memory_space<vmem>>, %arg8: memref<32x32xf32, #tpu.memory_space<vmem>>, %arg9: memref<1x32xf32, #tpu.memory_space<vmem>>, %arg10: memref<3x32x32xf32, #tpu.memory_space<vmem>>, %arg11: memref<3x32x32xf32, #tpu.memory_space<vmem>>, %arg12: memref<3x1x32xf32, #tpu.memory_space<vmem>>, %arg13: memref<3x1x32xf32, #tpu.memory_space<vmem>>, %arg14: memref<1x32xf32, #tpu.memory_space<vmem>>, %arg15: memref<1x32xf32, #tpu.memory_space<vmem>>, %arg16: memref<12x32xf32, #tpu.memory_space<vmem>>, %arg17: memref<12x32xf32, #tpu.memory_space<vmem>>) attributes {dimension_semantics = [], scalar_prefetch = 0 : i64, scratch_operands = 0 : i64, tpu.core_type = #tpu.core_type<tc>} {
    %c0 = arith.constant 0 : index
    %c0_0 = arith.constant 0 : index
    %0 = vector.load %arg0[%c0, %c0_0] : memref<12x32xf32, #tpu.memory_space<vmem>>, vector<12x32xf32>
    %c0_1 = arith.constant 0 : index
    %c0_2 = arith.constant 0 : index
    %1 = vector.load %arg2[%c0_1, %c0_2] : memref<24x12xf32, #tpu.memory_space<vmem>>, vector<24x12xf32>
    %c0_3 = arith.constant 0 : index
    %c0_4 = arith.constant 0 : index
    %2 = vector.load %arg3[%c0_3, %c0_4] : memref<24x12xf32, #tpu.memory_space<vmem>>, vector<24x12xf32>
    %c0_5 = arith.constant 0 : index
    %c0_6 = arith.constant 0 : index
    %3 = vector.load %arg4[%c0_5, %c0_6] : memref<12x24xf32, #tpu.memory_space<vmem>>, vector<12x24xf32>
    %cst = arith.constant dense<0.000000e+00> : vector<24x32xf32>
    %4 = tpu.matmul %2, %0, %cst {dimension_numbers = #tpu.dot_dimension_numbers<[1], [0], [0], [1], [0, 0, 1, 1], [], []>} : vector<24x12xf32>, vector<12x32xf32>, vector<24x32xf32> -> vector<24x32xf32>
    %cst_7 = arith.constant dense<0.000000e+00> : vector<24x32xf32>
    %5 = tpu.matmul %1, %0, %cst_7 {dimension_numbers = #tpu.dot_dimension_numbers<[1], [0], [0], [1], [0, 0, 1, 1], [], []>} : vector<24x12xf32>, vector<12x32xf32>, vector<24x32xf32> -> vector<24x32xf32>
    %c0_8 = arith.constant 0 : index
    %c0_9 = arith.constant 0 : index
    %6 = vector.load %arg5[%c0_8, %c0_9] : memref<32x1xf32, #tpu.memory_space<vmem>>, vector<32x1xf32>
    %cst_10 = arith.constant dense<0.000000e+00> : vector<24x1xf32>
    %7 = tpu.matmul %4, %6, %cst_10 {dimension_numbers = #tpu.dot_dimension_numbers<[1], [0], [0], [1], [0, 0, 1, 1], [], []>} : vector<24x32xf32>, vector<32x1xf32>, vector<24x1xf32> -> vector<24x1xf32>
    %c0_11 = arith.constant 0 : index
    %c0_12 = arith.constant 0 : index
    %8 = vector.load %arg6[%c0_11, %c0_12] : memref<32x1xf32, #tpu.memory_space<vmem>>, vector<32x1xf32>
    %cst_13 = arith.constant dense<0.000000e+00> : vector<24x1xf32>
    %9 = tpu.matmul %5, %8, %cst_13 {dimension_numbers = #tpu.dot_dimension_numbers<[1], [0], [0], [1], [0, 0, 1, 1], [], []>} : vector<24x32xf32>, vector<32x1xf32>, vector<24x1xf32> -> vector<24x1xf32>
    %10 = arith.addf %7, %9 : vector<24x1xf32>
    %c0_14 = arith.constant 0 : index
    %c0_15 = arith.constant 0 : index
    %11 = vector.load %arg7[%c0_14, %c0_15] : memref<1x1xf32, #tpu.memory_space<vmem>>, vector<1x1xf32>
    %12 = vector.broadcast %11 : vector<1x1xf32> to vector<24x1xf32>
    %13 = arith.addf %10, %12 : vector<24x1xf32>
    %cst_16 = arith.constant 0.000000e+00 : f32
    %14 = vector.broadcast %cst_16 : f32 to vector<24x1xf32>
    %15 = arith.cmpf ogt, %13, %14 : vector<24x1xf32>
    %cst_17 = arith.constant 0.00999999977 : f32
    %16 = vector.broadcast %cst_17 : f32 to vector<24x1xf32>
    %17 = arith.mulf %16, %13 : vector<24x1xf32>
    %18 = arith.select %15, %13, %17 : vector<24x1xi1>, vector<24x1xf32>
    %cst_18 = arith.constant 5.000000e-01 : f32
    %19 = vector.broadcast %cst_18 : f32 to vector<24x12xf32>
    %20 = arith.cmpf ogt, %2, %19 : vector<24x12xf32>
    %21 = vector.shape_cast %18 : vector<24x1xf32> to vector<24x1xf32>
    %22 = vector.broadcast %21 : vector<24x1xf32> to vector<24x12xf32>
    %cst_19 = arith.constant 0xFF800000 : f32
    %23 = vector.broadcast %cst_19 : f32 to vector<24x12xf32>
    %24 = arith.select %20, %22, %23 : vector<24x12xi1>, vector<24x12xf32>
    %cst_20 = arith.constant dense<0xFF800000> : vector<12xf32>
    %25 = vector.multi_reduction <maximumf>, %24, %cst_20 [0] : vector<24x12xf32> to vector<12xf32>
    %26 = vector.shape_cast %25 : vector<12xf32> to vector<1x12xf32>
    %cst_21 = arith.constant 0.000000e+00 : f32
    %27 = vector.shape_cast %26 : vector<1x12xf32> to vector<1x12xf32>
    %28 = vector.broadcast %27 : vector<1x12xf32> to vector<24x12xf32>
    %29 = vector.broadcast %cst_21 : f32 to vector<24x12xf32>
    %30 = arith.select %20, %28, %29 : vector<24x12xi1>, vector<24x12xf32>
    %cst_22 = arith.constant dense<0.000000e+00> : vector<24xf32>
    %31 = vector.multi_reduction <add>, %30, %cst_22 [1] : vector<24x12xf32> to vector<24xf32>
    %32 = vector.shape_cast %31 : vector<24xf32> to vector<24x1xf32>
    %33 = arith.subf %18, %32 : vector<24x1xf32>
    %34 = math.exp %33 : vector<24x1xf32>
    %cst_23 = arith.constant dense<0.000000e+00> : vector<12x1xf32>
    %35 = tpu.matmul %3, %34, %cst_23 {dimension_numbers = #tpu.dot_dimension_numbers<[1], [0], [0], [1], [0, 0, 1, 1], [], []>} : vector<12x24xf32>, vector<24x1xf32>, vector<12x1xf32> -> vector<12x1xf32>
    %cst_24 = arith.constant dense<0.000000e+00> : vector<24x1xf32>
    %36 = tpu.matmul %2, %35, %cst_24 {dimension_numbers = #tpu.dot_dimension_numbers<[1], [0], [0], [1], [0, 0, 1, 1], [], []>} : vector<24x12xf32>, vector<12x1xf32>, vector<24x1xf32> -> vector<24x1xf32>
    %37 = arith.divf %34, %36 : vector<24x1xf32>
    %c0_25 = arith.constant 0 : index
    %c0_26 = arith.constant 0 : index
    %38 = vector.load %arg8[%c0_25, %c0_26] : memref<32x32xf32, #tpu.memory_space<vmem>>, vector<32x32xf32>
    %cst_27 = arith.constant dense<0.000000e+00> : vector<12x32xf32>
    %39 = tpu.matmul %0, %38, %cst_27 {dimension_numbers = #tpu.dot_dimension_numbers<[1], [0], [0], [1], [0, 0, 1, 1], [], []>} : vector<12x32xf32>, vector<32x32xf32>, vector<12x32xf32> -> vector<12x32xf32>
    %c0_28 = arith.constant 0 : index
    %c0_29 = arith.constant 0 : index
    %40 = vector.load %arg9[%c0_28, %c0_29] : memref<1x32xf32, #tpu.memory_space<vmem>>, vector<1x32xf32>
    %41 = vector.broadcast %40 : vector<1x32xf32> to vector<12x32xf32>
    %42 = arith.addf %39, %41 : vector<12x32xf32>
    %cst_30 = arith.constant dense<0.000000e+00> : vector<24x32xf32>
    %43 = tpu.matmul %1, %42, %cst_30 {dimension_numbers = #tpu.dot_dimension_numbers<[1], [0], [0], [1], [0, 0, 1, 1], [], []>} : vector<24x12xf32>, vector<12x32xf32>, vector<24x32xf32> -> vector<24x32xf32>
    %44 = vector.broadcast %37 : vector<24x1xf32> to vector<24x32xf32>
    %45 = arith.mulf %43, %44 : vector<24x32xf32>
    %cst_31 = arith.constant dense<0.000000e+00> : vector<12x32xf32>
    %46 = tpu.matmul %3, %45, %cst_31 {dimension_numbers = #tpu.dot_dimension_numbers<[1], [0], [0], [1], [0, 0, 1, 1], [], []>} : vector<12x24xf32>, vector<24x32xf32>, vector<12x32xf32> -> vector<12x32xf32>
    %cst_32 = arith.constant 0.000000e+00 : f32
    %47 = vector.broadcast %cst_32 : f32 to vector<12x32xf32>
    %48 = arith.cmpf ogt, %46, %47 : vector<12x32xf32>
    %cst_33 = arith.constant 0.000000e+00 : f32
    %49 = vector.broadcast %cst_33 : f32 to vector<12x32xf32>
    %50 = arith.minimumf %46, %49 : vector<12x32xf32>
    %51 = math.exp %50 : vector<12x32xf32>
    %cst_34 = arith.constant 1.000000e+00 : f32
    %52 = vector.broadcast %cst_34 : f32 to vector<12x32xf32>
    %53 = arith.subf %51, %52 : vector<12x32xf32>
    %54 = arith.select %48, %46, %53 : vector<12x32xi1>, vector<12x32xf32>
    %c0_35 = arith.constant 0 : index
    %c0_36 = arith.constant 0 : index
    %c0_37 = arith.constant 0 : index
    %55 = vector.load %arg10[%c0_35, %c0_36, %c0_37] : memref<3x32x32xf32, #tpu.memory_space<vmem>>, vector<1x32x32xf32>
    %56 = vector.shape_cast %55 : vector<1x32x32xf32> to vector<32x32xf32>
    %cst_38 = arith.constant dense<0.000000e+00> : vector<12x32xf32>
    %57 = tpu.matmul %54, %56, %cst_38 {dimension_numbers = #tpu.dot_dimension_numbers<[1], [0], [0], [1], [0, 0, 1, 1], [], []>} : vector<12x32xf32>, vector<32x32xf32>, vector<12x32xf32> -> vector<12x32xf32>
    %c0_39 = arith.constant 0 : index
    %c0_40 = arith.constant 0 : index
    %c0_41 = arith.constant 0 : index
    %58 = vector.load %arg12[%c0_39, %c0_40, %c0_41] : memref<3x1x32xf32, #tpu.memory_space<vmem>>, vector<1x1x32xf32>
    %59 = vector.shape_cast %58 : vector<1x1x32xf32> to vector<1x32xf32>
    %60 = vector.broadcast %59 : vector<1x32xf32> to vector<12x32xf32>
    %61 = arith.addf %57, %60 : vector<12x32xf32>
    %c0_42 = arith.constant 0 : index
    %c0_43 = arith.constant 0 : index
    %c0_44 = arith.constant 0 : index
    %62 = vector.load %arg11[%c0_42, %c0_43, %c0_44] : memref<3x32x32xf32, #tpu.memory_space<vmem>>, vector<1x32x32xf32>
    %63 = vector.shape_cast %62 : vector<1x32x32xf32> to vector<32x32xf32>
    %cst_45 = arith.constant dense<0.000000e+00> : vector<12x32xf32>
    %64 = tpu.matmul %0, %63, %cst_45 {dimension_numbers = #tpu.dot_dimension_numbers<[1], [0], [0], [1], [0, 0, 1, 1], [], []>} : vector<12x32xf32>, vector<32x32xf32>, vector<12x32xf32> -> vector<12x32xf32>
    %65 = arith.addf %61, %64 : vector<12x32xf32>
    %c0_46 = arith.constant 0 : index
    %c0_47 = arith.constant 0 : index
    %c0_48 = arith.constant 0 : index
    %66 = vector.load %arg13[%c0_46, %c0_47, %c0_48] : memref<3x1x32xf32, #tpu.memory_space<vmem>>, vector<1x1x32xf32>
    %67 = vector.shape_cast %66 : vector<1x1x32xf32> to vector<1x32xf32>
    %68 = vector.broadcast %67 : vector<1x32xf32> to vector<12x32xf32>
    %69 = arith.addf %65, %68 : vector<12x32xf32>
    %c1 = arith.constant 1 : index
    %c0_49 = arith.constant 0 : index
    %c0_50 = arith.constant 0 : index
    %70 = vector.load %arg10[%c1, %c0_49, %c0_50] : memref<3x32x32xf32, #tpu.memory_space<vmem>>, vector<1x32x32xf32>
    %71 = vector.shape_cast %70 : vector<1x32x32xf32> to vector<32x32xf32>
    %cst_51 = arith.constant dense<0.000000e+00> : vector<12x32xf32>
    %72 = tpu.matmul %54, %71, %cst_51 {dimension_numbers = #tpu.dot_dimension_numbers<[1], [0], [0], [1], [0, 0, 1, 1], [], []>} : vector<12x32xf32>, vector<32x32xf32>, vector<12x32xf32> -> vector<12x32xf32>
    %c1_52 = arith.constant 1 : index
    %c0_53 = arith.constant 0 : index
    %c0_54 = arith.constant 0 : index
    %73 = vector.load %arg12[%c1_52, %c0_53, %c0_54] : memref<3x1x32xf32, #tpu.memory_space<vmem>>, vector<1x1x32xf32>
    %74 = vector.shape_cast %73 : vector<1x1x32xf32> to vector<1x32xf32>
    %75 = vector.broadcast %74 : vector<1x32xf32> to vector<12x32xf32>
    %76 = arith.addf %72, %75 : vector<12x32xf32>
    %c1_55 = arith.constant 1 : index
    %c0_56 = arith.constant 0 : index
    %c0_57 = arith.constant 0 : index
    %77 = vector.load %arg11[%c1_55, %c0_56, %c0_57] : memref<3x32x32xf32, #tpu.memory_space<vmem>>, vector<1x32x32xf32>
    %78 = vector.shape_cast %77 : vector<1x32x32xf32> to vector<32x32xf32>
    %cst_58 = arith.constant dense<0.000000e+00> : vector<12x32xf32>
    %79 = tpu.matmul %0, %78, %cst_58 {dimension_numbers = #tpu.dot_dimension_numbers<[1], [0], [0], [1], [0, 0, 1, 1], [], []>} : vector<12x32xf32>, vector<32x32xf32>, vector<12x32xf32> -> vector<12x32xf32>
    %80 = arith.addf %76, %79 : vector<12x32xf32>
    %c1_59 = arith.constant 1 : index
    %c0_60 = arith.constant 0 : index
    %c0_61 = arith.constant 0 : index
    %81 = vector.load %arg13[%c1_59, %c0_60, %c0_61] : memref<3x1x32xf32, #tpu.memory_space<vmem>>, vector<1x1x32xf32>
    %82 = vector.shape_cast %81 : vector<1x1x32xf32> to vector<1x32xf32>
    %83 = vector.broadcast %82 : vector<1x32xf32> to vector<12x32xf32>
    %84 = arith.addf %80, %83 : vector<12x32xf32>
    %c2 = arith.constant 2 : index
    %c0_62 = arith.constant 0 : index
    %c0_63 = arith.constant 0 : index
    %85 = vector.load %arg10[%c2, %c0_62, %c0_63] : memref<3x32x32xf32, #tpu.memory_space<vmem>>, vector<1x32x32xf32>
    %86 = vector.shape_cast %85 : vector<1x32x32xf32> to vector<32x32xf32>
    %cst_64 = arith.constant dense<0.000000e+00> : vector<12x32xf32>
    %87 = tpu.matmul %54, %86, %cst_64 {dimension_numbers = #tpu.dot_dimension_numbers<[1], [0], [0], [1], [0, 0, 1, 1], [], []>} : vector<12x32xf32>, vector<32x32xf32>, vector<12x32xf32> -> vector<12x32xf32>
    %c2_65 = arith.constant 2 : index
    %c0_66 = arith.constant 0 : index
    %c0_67 = arith.constant 0 : index
    %88 = vector.load %arg12[%c2_65, %c0_66, %c0_67] : memref<3x1x32xf32, #tpu.memory_space<vmem>>, vector<1x1x32xf32>
    %89 = vector.shape_cast %88 : vector<1x1x32xf32> to vector<1x32xf32>
    %90 = vector.broadcast %89 : vector<1x32xf32> to vector<12x32xf32>
    %91 = arith.addf %87, %90 : vector<12x32xf32>
    %c2_68 = arith.constant 2 : index
    %c0_69 = arith.constant 0 : index
    %c0_70 = arith.constant 0 : index
    %92 = vector.load %arg11[%c2_68, %c0_69, %c0_70] : memref<3x32x32xf32, #tpu.memory_space<vmem>>, vector<1x32x32xf32>
    %93 = vector.shape_cast %92 : vector<1x32x32xf32> to vector<32x32xf32>
    %cst_71 = arith.constant dense<0.000000e+00> : vector<12x32xf32>
    %94 = tpu.matmul %0, %93, %cst_71 {dimension_numbers = #tpu.dot_dimension_numbers<[1], [0], [0], [1], [0, 0, 1, 1], [], []>} : vector<12x32xf32>, vector<32x32xf32>, vector<12x32xf32> -> vector<12x32xf32>
    %c2_72 = arith.constant 2 : index
    %c0_73 = arith.constant 0 : index
    %c0_74 = arith.constant 0 : index
    %95 = vector.load %arg13[%c2_72, %c0_73, %c0_74] : memref<3x1x32xf32, #tpu.memory_space<vmem>>, vector<1x1x32xf32>
    %96 = vector.shape_cast %95 : vector<1x1x32xf32> to vector<1x32xf32>
    %97 = vector.broadcast %96 : vector<1x32xf32> to vector<12x32xf32>
    %98 = arith.addf %94, %97 : vector<12x32xf32>
    %99 = arith.negf %69 : vector<12x32xf32>
    %100 = math.exp %99 : vector<12x32xf32>
    %cst_75 = arith.constant 1.000000e+00 : f32
    %101 = vector.broadcast %cst_75 : f32 to vector<12x32xf32>
    %102 = arith.addf %101, %100 : vector<12x32xf32>
    %103 = arith.divf %101, %102 : vector<12x32xf32>
    %104 = arith.negf %84 : vector<12x32xf32>
    %105 = math.exp %104 : vector<12x32xf32>
    %cst_76 = arith.constant 1.000000e+00 : f32
    %106 = vector.broadcast %cst_76 : f32 to vector<12x32xf32>
    %107 = arith.addf %106, %105 : vector<12x32xf32>
    %108 = arith.divf %106, %107 : vector<12x32xf32>
    %109 = arith.mulf %103, %98 : vector<12x32xf32>
    %110 = arith.addf %91, %109 : vector<12x32xf32>
    %111 = math.tanh %110 : vector<12x32xf32>
    %cst_77 = arith.constant 1.000000e+00 : f32
    %112 = vector.broadcast %cst_77 : f32 to vector<12x32xf32>
    %113 = arith.subf %112, %108 : vector<12x32xf32>
    %114 = arith.mulf %113, %111 : vector<12x32xf32>
    %115 = arith.mulf %108, %0 : vector<12x32xf32>
    %116 = arith.addf %114, %115 : vector<12x32xf32>
    %cst_78 = arith.constant 0.000000e+00 : f32
    %117 = vector.broadcast %cst_78 : f32 to vector<12x32xf32>
    %118 = arith.maximumf %116, %117 : vector<12x32xf32>
    %c0_79 = arith.constant 0 : index
    %c0_80 = arith.constant 0 : index
    %119 = vector.load %arg14[%c0_79, %c0_80] : memref<1x32xf32, #tpu.memory_space<vmem>>, vector<1x32xf32>
    %120 = vector.broadcast %119 : vector<1x32xf32> to vector<12x32xf32>
    %121 = arith.mulf %118, %120 : vector<12x32xf32>
    %c0_81 = arith.constant 0 : index
    %c0_82 = arith.constant 0 : index
    %122 = vector.load %arg15[%c0_81, %c0_82] : memref<1x32xf32, #tpu.memory_space<vmem>>, vector<1x32xf32>
    %123 = vector.broadcast %122 : vector<1x32xf32> to vector<12x32xf32>
    %124 = arith.addf %121, %123 : vector<12x32xf32>
    %c0_83 = arith.constant 0 : index
    %c0_84 = arith.constant 0 : index
    %125 = vector.load %arg16[%c0_83, %c0_84] : memref<12x32xf32, #tpu.memory_space<vmem>>, vector<12x32xf32>
    tpu.vector_store %arg16[%c0_83, %c0_84], %124 {strides = array<i32>} : memref<12x32xf32, #tpu.memory_space<vmem>>, vector<12x32xf32>,
    %c0_85 = arith.constant 0 : index
    %c0_86 = arith.constant 0 : index
    %126 = vector.load %arg1[%c0_85, %c0_86] : memref<12x32xf32, #tpu.memory_space<vmem>>, vector<12x32xf32>
    %127 = arith.addf %126, %124 : vector<12x32xf32>
    %c0_87 = arith.constant 0 : index
    %c0_88 = arith.constant 0 : index
    %128 = vector.load %arg17[%c0_87, %c0_88] : memref<12x32xf32, #tpu.memory_space<vmem>>, vector<12x32xf32>
    tpu.vector_store %arg17[%c0_87, %c0_88], %127 {strides = array<i32>} : memref<12x32xf32, #tpu.memory_space<vmem>>, vector<12x32xf32>,
    return
  }
}

</mosaic_0001>

<bundles_post_ra>
// kernel: attentive_fp_forward.5
= control target key start
LH: loop header
LB: loop body
LE: loop exit
PB: predicated region body
PF: predicated region fallthrough
CT: control target
= control target key end

     0   :  { %vm26_vm0 = vcmask 261120   ;;  %vm56_vm1 = vcmask 7168   ;;  %vm58_vm2 = vcmask 3072   ;;  %s118_s1 = inlined_call_operand.vmem [shape: f32[32,1], index: 1, kind: input, shape index: {}]   ;;  %s119_s2 = inlined_call_operand.<no memory space> [shape: f32[1,1], index: 2, kind: input, shape index: {}]   ;;  %s120_s0 = inlined_call_operand.vmem [shape: f32[12,32], index: 0, kind: input, shape index: {}]   ;;  %s121_s3 = inlined_call_operand.vmem [shape: f32[12,1], index: 3, kind: output, shape index: {}]  }
   0x1   :  { %v21_v0 = vld [vmem:[%s118_s1 + $0x18] sm:$0xff]  ;;  %v20_v1 = vld [vmem:[%s118_s1 + $0x10] sm:$0xff]  ;;  %v8_v2 = vstv %s119_s2  ;;  %v19_v3 = vld [vmem:[%s118_s1 + $0x8] sm:$0xff] }
   0x2   :  { %45 = vmatpush.msra.mxu0 %v21_v0  ;;  %66 = vmatpush.msra.mxu1 %v21_v0  ;;  %9 = vst [vmem:[#allocation2] sm:$0x1] %v8_v2  ;;  %v18_v4 = vld [vmem:[%s118_s1] sm:$0xff]  ;;  %v17_v6 = vld [vmem:[%s120_s0 + $0x8] sm:$0xf] }
   0x3   :  { %v16_v5 = vld [vmem:[%s120_s0] sm:$0xff] }
   0x4   :  { %46 = vmatpush.msra.mxu0 %v20_v1  ;;  %67 = vmatpush.msra.mxu1 %v20_v1 }
   0x6   :  { %47 = vmatpush.msra.mxu0 %v19_v3  ;;  %68 = vmatpush.msra.mxu1 %v19_v3 }
   0x8   :  { %48 = vmatpush.msra.mxu0 %v18_v4  ;;  %69 = vmatpush.msra.mxu1 %v18_v4 }
   0x9   :  { %64 = vmatmul.msk.f32.vlgmr.msra.gmra.mxu0 %vm26_vm0, %v16_v5  ;;  %65 = vmatmul.msk.f32.vlgmr.msra.gmra.mxu1 %vm26_vm0, %v17_v6  ;;  %v70_v7 = vld [vmem:[#allocation2] ss:$0 sm:$0xff] }
  0x86   :  { %v50_v8 = vpop.f32.mrf.mxu0  ;;  %v53_v9 = vpop.f32.mrf.mxu1 }
  0x87   :  { %v51_v10 = vadd.f32 %v70_v7, %v50_v8  ;;  %v54_v11 = vadd.f32 %v70_v7, %v53_v9 }
  0x89   :  { %57 = vst.msk [vmem:[%s121_s3] sm:$0xff] %vm56_vm1, %v51_v10 }
  0x8a   :  { %59 = vst.msk [vmem:[%s121_s3 + $0x8] sm:$0xf] %vm58_vm2, %v54_v11 }

// kernel: attentive_fp_forward.3
= control target key start
LH: loop header
LB: loop body
LE: loop exit
PB: predicated region body
PF: predicated region fallthrough
CT: control target
= control target key end

     0   :  { %s1484_s0 = inlined_call_operand.vmem [shape: f32[12,16], index: 0, kind: input, shape index: {}]   ;;  %s1485_s1 = inlined_call_operand.vmem [shape: f32[24,8], index: 1, kind: input, shape index: {}]   ;;  %s1486_s2 = inlined_call_operand.vmem [shape: f32[24,12], index: 2, kind: input, shape index: {}]   ;;  %s1487_s3 = inlined_call_operand.vmem [shape: f32[24,12], index: 3, kind: input, shape index: {}]   ;;  %s1488_s4 = inlined_call_operand.vmem [shape: f32[12,24], index: 4, kind: input, shape index: {}]   ;;  %s1489_s5 = inlined_call_operand.vmem [shape: f32[16,32], index: 5, kind: input, shape index: {}]   ;;  %s1490_s6 = inlined_call_operand.vmem [shape: f32[1,32], index: 6, kind: input, shape index: {}]   ;;  %s1491_s7 = inlined_call_operand.vmem [shape: f32[16,32], index: 7, kind: input, shape index: {}]   ;;  %s1492_s8 = inlined_call_operand.vmem [shape: f32[8,32], index: 8, kind: input, shape index: {}]   ;;  %s1493_s9 = inlined_call_operand.vmem [shape: f32[1,32], index: 9, kind: input, shape index: {}]   ;;  %s1494_s10 = inlined_call_operand.vmem [shape: f32[32,1], index: 10, kind: input, shape index: {}]   ;;  %s1495_s11 = inlined_call_operand.vmem [shape: f32[32,1], index: 11, kind: input, shape index: {}]   ;;  %s1496_s12 = inlined_call_operand.<no memory space> [shape: f32[1,1], index: 12, kind: input, shape index: {}]   ;;  %s1497_s13 = inlined_call_operand.vmem [shape: f32[32,32], index: 13, kind: input, shape index: {}]   ;;  %s1498_s14 = inlined_call_operand.vmem [shape: f32[1,32], index: 14, kind: input, shape index: {}]   ;;  %s1499_s15 = inlined_call_operand.hbm [shape: f32[3,32,32], index: 15, kind: input, shape index: {}]   ;;  %s1500_s16 = inlined_call_operand.hbm [shape: f32[3,32,32], index: 16, kind: input, shape index: {}]   ;;  %s1501_s17 = inlined_call_operand.vmem [shape: f32[3,1,32], index: 17, kind: input, shape index: {}]   ;;  %s1502_s18 = inlined_call_operand.vmem [shape: f32[3,1,32], index: 18, kind: input, shape index: {}]   ;;  %s1503_s19 = inlined_call_operand.vmem [shape: f32[12,32], index: 19, kind: output, shape index: {}]  }
   0x1   :  { %1508 = sst [smem:[#allocation9_spill]] %s1484_s0  ;;  %v24_v0 = vstv %s1496_s12 }
   0x2   :  { %1509 = sst [smem:[#allocation10_spill]] %s1485_s1  ;;  %25 = vst [vmem:[#allocation2] sm:$0x1] %v24_v0 }
   0x3   :  { %1510 = sst [smem:[#allocation11_spill]] %s1486_s2 }
   0x4   :  { %1511 = sst [smem:[#allocation12_spill]] %s1487_s3 }
   0x5   :  { %26 = vsyncpa [#allocation4], 0  ;;  %s62_s1 = sshll.u32 %s1499_s15, 4  ;;  %s63_s1 = int_to_ptr.hbm [resolvable:$true] %s62_s1 }
   0x6   :  { %27 = vsyncpa [#allocation6], 0  ;;  %s1133_s22 = smov [#allocation3]   ;;  %s75_s25 = sshll.u32 %s1500_s16, 4  ;;  %s76_s25 = int_to_ptr.hbm [resolvable:$true] %s75_s25 }
   0x7   :  { %s64_s2 = sshll.u32 %s1133_s22, 4  ;;  %s1134_s3 = smov 128   ;;  %s65_s2 = int_to_ptr.vmem [resolvable:$true] %s64_s2 }
   0x8   :  { %s1135_s26 = smov 8   ;;  %s1136_s12 = smov [#allocation5]  }
   0x9   :  { %70 = dma.hbm_to_vmem [thread:$0]  %s63_s1, 1536, %s65_s2, [#allocation4], %s1134_s3, %s1134_s3, %s1135_s26  }
   0xa   :  { %s77_s27 = sshll.u32 %s1136_s12, 4  ;;  %s78_s27 = int_to_ptr.vmem [resolvable:$true] %s77_s27 }
   0xb   :  { %83 = dma.hbm_to_vmem [thread:$0]  %s76_s25, 1536, %s78_s27, [#allocation6], %s1134_s3, %s1134_s3, %s1135_s26  }
   0xc   :  { %1129 = dma.done.wait [#allocation4], 1536  }
   0xd   :  { %1130 = vsyncadd [#allocation4], 4294965760 }
   0xe   :  { %1131 = dma.done.wait [#allocation6], 1536  }
   0xf   :  { %1132 = vsyncadd [#allocation6], 4294965760  ;;  %vm161_vm0 = vcmask 1043456   ;;  %v110_v1 = vld [vmem:[%s1489_s5 + $0x8] sm:$0xff]  ;;  %s1512_s16 = sld [smem:[#allocation9_spill]]  ;;  %v109_v3 = vld [vmem:[%s1489_s5] sm:$0xff] }
  0x10   :  { %136 = vmatpush.msra.mxu0 %v110_v1  ;;  %vm115_vm1 = vcmask 130048   ;;  %s1513_s23 = sld [smem:[#allocation11_spill]]  ;;  %vm151_vm2 = vcmask 97280   ;;  %v191_v6 = vld [vmem:[%s1491_s7 + $0x8] sm:$0xff]  ;;  %v190_v9 = vld [vmem:[%s1491_s7] sm:$0xff]  ;;  %vm193_vm3 = vcmask 64512  }
  0x11   :  { %252 = vmatpush.msra.mxu3 %v191_v6  ;;  %v192_v10 = vld [vmem:[%s1492_s8] sm:$0xff]  ;;  %s1514_s30 = sld [smem:[#allocation10_spill]]  ;;  %v325_v29 = vld [vmem:[%s1495_s11 + $0x18] sm:$0xff]  ;;  %v324_v30 = vld [vmem:[%s1495_s11 + $0x10] sm:$0xff]  ;;  %vm326_vm7 = vcmask 261120   ;;  %v1137_v59 = vmov 0  }
  0x12   :  { %137 = vmatpush.msra.mxu0 %v109_v3  ;;  %1026 = vmatpush.msra.mxu2 %v192_v10  ;;  %v1035_v16 = vld [vmem:[%s1490_s6] ss:$0 sm:$0xff]  ;;  %s1515_s24 = sld [smem:[#allocation12_spill]]  ;;  %v323_v31 = vld [vmem:[%s1495_s11 + $0x8] sm:$0xff]  ;;  %v321_v33 = vld [vmem:[%s1494_s10 + $0x18] sm:$0xff] }
  0x13   :  { %253 = vmatpush.msra.mxu3 %v190_v9  ;;  %v322_v32 = vld [vmem:[%s1495_s11] sm:$0xff]  ;;  %v320_v34 = vld [vmem:[%s1494_s10 + $0x10] sm:$0xff]  ;;  %v319_v35 = vld [vmem:[%s1494_s10 + $0x8] sm:$0xff]  ;;  %1032 = vset.pattern.permute.xlu0 %v1137_v59 }
  0x14   :  { %218 = vmatpush.msrb.mxu0 %v192_v10  ;;  %348 = vmatpush.msrb.mxu2 %v325_v29  ;;  %v318_v36 = vld [vmem:[%s1494_s10] sm:$0xff] }
  0x15   :  { %v97_v2 = vld [vmem:[%s1512_s16 + $0x8] sm:$0xf]  ;;  %v96_v4 = vld [vmem:[%s1512_s16] sm:$0xff]  ;;  %1033 = vset.pattern.permute.xlu1 %v1137_v59  ;;  %1034 = vset.pattern.permute.xlu2 %v1137_v59  ;;  %v573_v59 = vld [vmem:[%s1497_s13 + $0x18] sm:$0xff] }
  0x16   :  { %973 = vmatpush.msk.msra.mxu1 %vm161_vm0, %v97_v2  ;;  %v101_v5 = vld [vmem:[%s1513_s23] sm:$0xff]  ;;  %971 = vmatmul.msk.f32.vlgmr.msra.gmra.mxu0 %vm115_vm1, %v96_v4  ;;  %v102_v7 = vld [vmem:[%s1513_s23 + $0x8] sm:$0xff]  ;;  %v103_v8 = vld [vmem:[%s1513_s23 + $0x10] sm:$0xff] }
  0x17   :  { %v98_v11 = vld [vmem:[%s1514_s30] sm:$0xff]  ;;  %v99_v12 = vld [vmem:[%s1514_s30 + $0x8] sm:$0xff]  ;;  %v100_v13 = vld [vmem:[%s1514_s30 + $0x10] sm:$0xff]  ;;  %349 = vmatpush.msrb.mxu2 %v324_v30 }
  0x18   :  { %179 = vmatpush.msra.mxu1 %v96_v4  ;;  %978 = vmatmul.msk.f32.vlgmr.msra.gmra.mxu2 %vm193_vm3, %v99_v12  ;;  %v1304_v24 = vld [vmem:[%s1515_s24] sm:$0xff]  ;;  %v1315_v27 = vld [vmem:[%s1515_s24 + $0x8] sm:$0xff]  ;;  %v1322_v28 = vld [vmem:[%s1515_s24 + $0x10] sm:$0xff] }
  0x19   :  { %974 = vmatmul.msk.f32.vlgmr.msra.gmra.mxu1 %vm151_vm2, %v101_v5  ;;  %350 = vmatpush.msrb.mxu2 %v323_v31  ;;  %v1036_v38 = vld [vmem:[%s1493_s9] ss:$0 sm:$0xff]  ;;  %vm414_vm13 = vcmp.gt.f32.partialorder %v1315_v27, 0.5  ;;  %vm413_vm14 = vcmp.gt.f32.partialorder %v1304_v24, 0.5  ;;  %vm415_vm15 = vcmp.gt.f32.partialorder %v1322_v28, 0.5 }
  0x1a   :  { %383 = vmatpush.msrb.mxu1 %v321_v33  ;;  %v1037_v61 = vld [vmem:[#allocation2] ss:$0 sm:$0xff] }
  0x1b   :  { %351 = vmatpush.msrb.mxu2 %v322_v32 }
  0x1c   :  { %384 = vmatpush.msrb.mxu1 %v320_v34 }
  0x1e   :  { %972 = vmatmul.msk.f32.gmra.mxu0 %vm115_vm1, %v97_v2  ;;  %385 = vmatpush.msrb.mxu1 %v319_v35 }
  0x20   :  { %979 = vmatmul.msk.f32.gmra.mxu2 %vm193_vm3, %v100_v13  ;;  %386 = vmatpush.msrb.mxu1 %v318_v36 }
  0x21   :  { %975 = vmatmul.msk.f32.gmra.mxu1 %vm151_vm2, %v102_v7 }
  0x26   :  { %977 = vmatmul.msk.f32.vlgmr.msrb.gmra.mxu0 %vm193_vm3, %v98_v11 }
  0x29   :  { %976 = vmatmul.msk.f32.gmra.mxu1 %vm151_vm2, %v103_v8 }
  0x93   :  { %v139_v14 = vpop.f32.mrf.mxu0 }
  0x94   :  { %v140_v17 = vadd.f32 %v1035_v16, %v139_v14 }
  0x96   :  { %v181_v15 = vpop.f32.mrf.mxu1  ;;  %v147_v21 = vmul.f32 0.01, %v140_v17  ;;  %vm145_vm5 = vcmp.gt.f32.partialorder %v140_v17, 0.0 }
  0x97   :  { %980 = vmatmul.msk.f32.vlgmr.msra.gmra.mxu3 %vm115_vm1, %v181_v15 }
  0x98   :  { %v1306_v25 = vsel %vm145_vm5, %v140_v17, %v147_v21 }
  0x9b   :  { %v142_v18 = vpop.f32.mrf.mxu0  ;;  %v223_v42 = vpop.f32.mrf.mxu2 }
  0x9c   :  { %v143_v20 = vadd.f32 %v1035_v16, %v142_v18 }
  0x9e   :  { %v184_v19 = vpop.f32.mrf.mxu1  ;;  %vm146_vm4 = vcmp.gt.f32.partialorder %v143_v20, 0.0  ;;  %v148_v22 = vmul.f32 0.01, %v143_v20 }
  0x9f   :  { %981 = vmatmul.msk.f32.gmra.mxu3 %vm115_vm1, %v184_v19 }
  0xa0   :  { %v1297_v23 = vsel %vm146_vm4, %v143_v20, %v148_v22 }
  0xa1   :  { %983 = vmatpush.msk.msra.mxu0 %vm161_vm0, %v1297_v23 }
  0xa3   :  { %307 = vmatpush.msra.mxu0 %v1306_v25  ;;  %v220_v37 = vpop.f32.mrf.mxu0  ;;  %v226_v50 = vpop.f32.mrf.mxu2 }
  0xa4   :  { %984 = vmatmul.msk.f32.vlgmr.msra.gmra.mxu0 %vm151_vm2, %v1304_v24 }
  0xa6   :  { %v187_v26 = vpop.f32.mrf.mxu1 }
  0xa7   :  { %982 = vmatmul.msk.f32.gmra.mxu3 %vm115_vm1, %v187_v26  ;;  %vm466_vm1 = vcmask 195584  }
  0xac   :  { %985 = vmatmul.msk.f32.gmra.mxu0 %vm151_vm2, %v1315_v27 }
  0xb4   :  { %986 = vmatmul.msk.f32.gmra.mxu0 %vm151_vm2, %v1322_v28 }
 0x11a   :  { %v255_v39 = vpop.f32.mrf.mxu3 }
 0x11b   :  { %v256_v40 = vadd.f32 %v255_v39, %v220_v37 }
 0x11d   :  { %v268_v41 = vadd.f32 %v1036_v38, %v256_v40 }
 0x11f   :  { %v274_v43 = vmul.f32 0.01, %v268_v41  ;;  %vm271_vm6 = vcmp.gt.f32.partialorder %v268_v41, 0.0 }
 0x121   :  { %v1353_v44 = vsel %vm271_vm6, %v268_v41, %v274_v43  ;;  %v309_v47 = vpop.f32.mrf.mxu0 }
 0x122   :  { %v258_v45 = vpop.f32.mrf.mxu3  ;;  %987 = vmatmul.msk.f32.vlgmr.msrb.gmra.mxu2 %vm326_vm7, %v1353_v44  ;;  %990 = vmatmul.msk.f32.vlgmr.msrb.gmra.mxu1 %vm326_vm7, %v309_v47 }
 0x123   :  { %v259_v46 = vadd.f32 %v258_v45, %v223_v42 }
 0x125   :  { %v269_v48 = vadd.f32 %v1036_v38, %v259_v46 }
 0x127   :  { %vm272_vm8 = vcmp.gt.f32.partialorder %v269_v48, 0.0  ;;  %v275_v49 = vmul.f32 0.01, %v269_v48 }
 0x129   :  { %v1358_v51 = vsel %vm272_vm8, %v269_v48, %v275_v49  ;;  %v312_v54 = vpop.f32.mrf.mxu0 }
 0x12a   :  { %v261_v52 = vpop.f32.mrf.mxu3  ;;  %988 = vmatmul.msk.f32.gmra.mxu2 %vm326_vm7, %v1358_v51  ;;  %991 = vmatmul.msk.f32.gmra.mxu1 %vm326_vm7, %v312_v54 }
 0x12b   :  { %v262_v53 = vadd.f32 %v261_v52, %v226_v50 }
 0x12d   :  { %v270_v55 = vadd.f32 %v1036_v38, %v262_v53 }
 0x12f   :  { %vm273_vm9 = vcmp.gt.f32.partialorder %v270_v55, 0.0  ;;  %v276_v56 = vmul.f32 0.01, %v270_v55 }
 0x131   :  { %v1363_v57 = vsel %vm273_vm9, %v270_v55, %v276_v56  ;;  %v315_v58 = vpop.f32.mrf.mxu0  ;;  %v1391_v56 = vld [vmem:[%s1488_s4] sm:$0xff] }
 0x132   :  { %989 = vmatmul.msk.f32.gmra.mxu2 %vm326_vm7, %v1363_v57  ;;  %992 = vmatmul.msk.f32.gmra.mxu1 %vm326_vm7, %v315_v58 }
 0x19f   :  { %v388_v60 = vpop.f32.mrf.mxu1 }
 0x1a5   :  { %v353_v62 = vpop.f32.mrf.mxu2 }
 0x1a6   :  { %v389_v63 = vadd.f32 %v388_v60, %v353_v62  ;;  %v572_v60 = vld [vmem:[%s1497_s13 + $0x10] sm:$0xff]  ;;  %v570_v62 = vld [vmem:[%s1497_s13] sm:$0xff] }
 0x1a7   :  { %v391_v2 = vpop.f32.mrf.mxu1 }
 0x1a8   :  { %v401_v0 = vadd.f32 %v1037_v61, %v389_v63  ;;  %v1413_v63 = vld [vmem:[%s1488_s4 + $0x8] sm:$0xf] }
 0x1aa   :  { %vm404_vm10 = vcmp.gt.f32.partialorder %v401_v0, 0.0  ;;  %v407_v1 = vmul.f32 0.01, %v401_v0 }
 0x1ac   :  { %v410_v3 = vsel %vm404_vm10, %v401_v0, %v407_v1 }
 0x1ad   :  { %v356_v4 = vpop.f32.mrf.mxu2  ;;  %418 = vperm.xlu0 %1032, %v410_v3  }
 0x1ae   :  { %v392_v5 = vadd.f32 %v391_v2, %v356_v4 }
 0x1af   :  { %v394_v8 = vpop.f32.mrf.mxu1 }
 0x1b0   :  { %v402_v6 = vadd.f32 %v1037_v61, %v392_v5 }
 0x1b2   :  { %vm405_vm11 = vcmp.gt.f32.partialorder %v402_v6, 0.0  ;;  %v408_v7 = vmul.f32 0.01, %v402_v6 }
 0x1b4   :  { %v411_v9 = vsel %vm405_vm11, %v402_v6, %v408_v7 }
 0x1b5   :  { %v359_v10 = vpop.f32.mrf.mxu2  ;;  %423 = vperm.xlu0 %1032, %v411_v9  }
 0x1b6   :  { %v395_v11 = vadd.f32 %v394_v8, %v359_v10 }
 0x1b8   :  { %v403_v12 = vadd.f32 %v1037_v61, %v395_v11  ;;  %v571_v61 = vld [vmem:[%s1497_s13 + $0x8] sm:$0xff] }
 0x1ba   :  { %vm406_vm12 = vcmp.gt.f32.partialorder %v403_v12, 0.0  ;;  %v409_v13 = vmul.f32 0.01, %v403_v12 }
 0x1bc   :  { %v412_v14 = vsel %vm406_vm12, %v403_v12, %v409_v13 }
 0x1bd   :  { %428 = vperm.xlu1 %1033, %v412_v14  }
 0x21f   :  { %v419_v15 = vpop.permute.xlu0 %418 }
 0x220   :  { %v431_v18 = vsel %vm413_vm14, %v419_v15, -inf }
 0x221   :  { %v434_v20 = vsel %vm151_vm2, %v431_v18, -inf }
 0x227   :  { %v424_v16 = vpop.permute.xlu0 %423 }
 0x228   :  { %v432_v17 = vsel %vm414_vm13, %v424_v16, -inf }
 0x229   :  { %v435_v19 = vsel %vm151_vm2, %v432_v17, -inf }
 0x22a   :  { %v437_v22 = vmax.f32 %v434_v20, %v435_v19 }
 0x22f   :  { %v429_v21 = vpop.permute.xlu1 %428 }
 0x230   :  { %v433_v26 = vsel %vm415_vm15, %v429_v21, -inf }
 0x231   :  { %v436_v29 = vsel %vm151_vm2, %v433_v26, -inf }
 0x232   :  { %v438_v30 = vmax.f32 %v437_v22, %v436_v29 }
 0x234   :  { %v439_v31 = vrot.slane %v438_v30, 4 }
 0x236   :  { %v440_v32 = vmax.f32 %v438_v30, %v439_v31 }
 0x238   :  { %v441_v33 = vrot.slane %v440_v32, 2 }
 0x23a   :  { %v442_v34 = vmax.f32 %v440_v32, %v441_v33 }
 0x23c   :  { %v443_v35 = vrot.slane %v442_v34, 1 }
 0x23e   :  { %v444_v36 = vmax.f32 %v442_v34, %v443_v35 }
 0x240   :  { %v447_v37 = vsel %vm415_vm15, %v444_v36, 0.0  ;;  %v446_v38 = vsel %vm414_vm13, %v444_v36, 0.0  ;;  %v445_v41 = vsel %vm413_vm14, %v444_v36, 0.0 }
 0x241   :  { %v454_v39 = vsel %vm151_vm2, %v447_v37, 0.0  ;;  %v451_v40 = vsel %vm151_vm2, %v446_v38, 0.0  ;;  %v448_v42 = vsel %vm151_vm2, %v445_v41, 0.0 }
 0x242   :  { %455 = vadd.xlane.f32.xlu1 %v454_v39  ;;  %452 = vadd.xlane.f32.xlu2 %v451_v40  ;;  %v1038_v40 = vld [vmem:[%s1498_s14] ss:$0 sm:$0xff] }
 0x24a   :  { %449 = vadd.xlane.f32.xlu2 %v448_v42 }
 0x2b5   :  { %v456_v43 = vpop.xlane.xlu1 %455  ;;  %v453_v45 = vpop.xlane.xlu2 %452 }
 0x2b6   :  { %v459_v46 = vsub.f32 %v412_v14, %v456_v43  ;;  %v458_v47 = vsub.f32 %v411_v9, %v453_v45 }
 0x2b8   :  { %v464_v48 = vmul.f32 1.442695, %v459_v46  ;;  %v462_v49 = vmul.f32 1.442695, %v458_v47 }
 0x2ba   :  { %1045 = vpow2.f32 %v464_v48 }
 0x2bb   :  { %1047 = vpow2.f32 %v462_v49 }
 0x2bd   :  { %v450_v50 = vpop.xlane.xlu2 %449 }
 0x2be   :  { %v457_v52 = vsub.f32 %v410_v3, %v450_v50 }
 0x2c0   :  { %v1385_v53 = vpop.eup %1045  ;;  %v460_v54 = vmul.f32 1.442695, %v457_v52  ;;  %v697_v52 = vld [vmem:[#allocation5 + $0x18] sm:$0xff] }
 0x2c1   :  { %486 = vmatpush.msrb.mxu3 %v1385_v53  ;;  %v1048_v55 = vpop.eup %1047 }
 0x2c2   :  { %1049 = vpow2.f32 %v460_v54  ;;  %v695_v54 = vld [vmem:[#allocation5 + $0x8] sm:$0xff] }
 0x2c3   :  { %487 = vmatpush.msrb.mxu3 %v1048_v55 }
 0x2c8   :  { %v1393_v58 = vpop.eup %1049 }
 0x2c9   :  { %488 = vmatpush.msrb.mxu3 %v1393_v58 }
 0x2ca   :  { %993 = vmatmul.msk.f32.vlgmr.msrb.gmra.mxu3 %vm466_vm1, %v1391_v56 }
 0x2cb   :  { %590 = vmatpush.msra.mxu3 %v573_v59  ;;  %v840_v59 = vld [vmem:[#allocation5 + $0x50] sm:$0xff] }
 0x2cd   :  { %591 = vmatpush.msra.mxu3 %v572_v60  ;;  %v839_v60 = vld [vmem:[#allocation5 + $0x48] sm:$0xff] }
 0x2cf   :  { %592 = vmatpush.msra.mxu3 %v571_v61  ;;  %v838_v61 = vld [vmem:[#allocation5 + $0x40] sm:$0xff] }
 0x2d1   :  { %593 = vmatpush.msra.mxu3 %v570_v62  ;;  %v738_v62 = vld [vmem:[#allocation3 + $0x38] sm:$0xff] }
 0x2d2   :  { %994 = vmatmul.msk.f32.gmra.mxu3 %vm466_vm1, %v1413_v63 }
 0x2da   :  { %999 = vmatmul.msk.f32.vlgmr.msra.gmra.mxu3 %vm326_vm7, %v1353_v44 }
 0x2e2   :  { %1000 = vmatmul.msk.f32.gmra.mxu3 %vm326_vm7, %v1358_v51 }
 0x2ea   :  { %1001 = vmatmul.msk.f32.gmra.mxu3 %vm326_vm7, %v1363_v57 }
 0x34d   :  { %v490_v0 = vpop.f32.mrf.mxu3 }
 0x355   :  { %v493_v1 = vpop.f32.mrf.mxu3 }
 0x356   :  { %995 = vmatpush.msk.msrb.mxu0 %vm161_vm0, %v493_v1  ;;  %v737_v1 = vld [vmem:[#allocation3 + $0x30] sm:$0xff] }
 0x358   :  { %514 = vmatpush.msrb.mxu0 %v490_v0  ;;  %v659_v0 = vld [vmem:[#allocation3 + $0x10] sm:$0xff] }
 0x359   :  { %996 = vmatmul.msk.f32.vlgmr.msrb.gmra.mxu0 %vm151_vm2, %v1304_v24 }
 0x35a   :  { %756 = vmatpush.msra.mxu0 %v738_v62 }
 0x35c   :  { %757 = vmatpush.msra.mxu0 %v737_v1 }
 0x35d   :  { %v595_v37 = vpop.f32.mrf.mxu3 }
 0x35e   :  { %v596_v48 = vadd.f32 %v1038_v40, %v595_v37  ;;  %v1042_v37 = vld [vmem:[%s1501_s17 + $0x1] ss:$0 sm:$0xff] }
 0x361   :  { %997 = vmatmul.msk.f32.gmra.mxu0 %vm151_vm2, %v1315_v27 }
 0x365   :  { %v598_v38 = vpop.f32.mrf.mxu3 }
 0x366   :  { %v599_v45 = vadd.f32 %v1038_v40, %v598_v38 }
 0x369   :  { %998 = vmatmul.msk.f32.gmra.mxu0 %vm151_vm2, %v1322_v28 }
 0x36d   :  { %v601_v39 = vpop.f32.mrf.mxu3 }
 0x36e   :  { %v602_v41 = vadd.f32 %v1038_v40, %v601_v39 }
 0x3d6   :  { %v516_v44 = vpop.f32.mrf.mxu0 }
 0x3d7   :  { %v536_v29 = vand.u32 2147483648, %v516_v44  ;;  %vm530_vm11 = vweird.f32 %v516_v44  ;;  %v534_v32 = vand.u32 2147483647, %v516_v44 }
 0x3d9   :  { %v537_v34 = vor.u32 1.1754944e-38, %v536_v29  ;;  %vm535_vm13 = vcmp.eq.f32.partialorder %v534_v32, 8.507059e+37 }
 0x3de   :  { %v519_v2 = vpop.f32.mrf.mxu0 }
 0x3df   :  { %1051 = vrcp.f32 %v519_v2  ;;  %v551_v6 = vand.u32 2147483648, %v519_v2  ;;  %v549_v24 = vand.u32 2147483647, %v519_v2  ;;  %vm545_vm3 = vweird.f32 %v519_v2 }
 0x3e0   :  { %1053 = vrcp.f32 %v516_v44 }
 0x3e1   :  { %v552_v10 = vor.u32 1.1754944e-38, %v551_v6  ;;  %vm550_vm4 = vcmp.eq.f32.partialorder %v549_v24, 8.507059e+37  ;;  %v771_v6 = vld [vmem:[#allocation5 + $0x38] sm:$0xff]  ;;  %v768_v24 = vld [vmem:[#allocation5 + $0x20] sm:$0xff] }
 0x3e5   :  { %v1052_v51 = vpop.eup %1051 }
 0x3e6   :  { %v541_v57 = vmul.f32 %v1052_v51, %v519_v2  ;;  %v522_v3 = vpop.f32.mrf.mxu0  ;;  %v1054_v4 = vpop.eup %1053  ;;  %vm546_vm0 = vweird.f32 %v1052_v51  ;;  %v658_v2 = vld [vmem:[#allocation3 + $0x8] sm:$0xff] }
 0x3e7   :  { %1055 = vrcp.f32 %v522_v3  ;;  %v526_v7 = vmul.f32 %v1054_v4, %v516_v44  ;;  %vm547_vm2 = vmor %vm545_vm3, %vm546_vm0  ;;  %v566_v16 = vand.u32 2147483648, %v522_v3  ;;  %v564_v19 = vand.u32 2147483647, %v522_v3  ;;  %v807_v44 = vld [vmem:[#allocation3 + $0x50] sm:$0xff] }
 0x3e8   :  { %v542_v5 = vsub.f32 1.0, %v541_v57  ;;  %vm560_vm6 = vweird.f32 %v522_v3  ;;  %vm531_vm10 = vweird.f32 %v1054_v4  ;;  %v806_v57 = vld [vmem:[#allocation3 + $0x48] sm:$0xff] }
 0x3e9   :  { %v527_v28 = vsub.f32 1.0, %v526_v7  ;;  %v567_v21 = vor.u32 1.1754944e-38, %v566_v16  ;;  %vm565_vm9 = vcmp.eq.f32.partialorder %v564_v19, 8.507059e+37  ;;  %vm532_vm12 = vmor %vm530_vm11, %vm531_vm10  ;;  %v770_v7 = vld [vmem:[#allocation5 + $0x30] sm:$0xff]  ;;  %v1040_v19 = vld [vmem:[%s1501_s17] ss:$0 sm:$0xff] }
 0x3ea   :  { %v543_v8 = vmul.f32 %v1052_v51, %v542_v5  ;;  %v805_v5 = vld [vmem:[#allocation3 + $0x40] sm:$0xff] }
 0x3eb   :  { %v528_v17 = vmul.f32 %v1054_v4, %v527_v28 }
 0x3ec   :  { %v544_v27 = vadd.f32 %v1052_v51, %v543_v8  ;;  %v769_v8 = vld [vmem:[#allocation5 + $0x28] sm:$0xff] }
 0x3ed   :  { %v1056_v9 = vpop.eup %1055  ;;  %v529_v26 = vadd.f32 %v1054_v4, %v528_v17 }
 0x3ee   :  { %v556_v11 = vmul.f32 %v1056_v9, %v522_v3  ;;  %v548_v12 = vsel %vm547_vm2, %v1052_v51, %v544_v27  ;;  %vm561_vm5 = vweird.f32 %v1056_v9  ;;  %v736_v51 = vld [vmem:[#allocation3 + $0x28] sm:$0xff]  ;;  %v657_v3 = vld [vmem:[#allocation3] sm:$0xff] }
 0x3ef   :  { %v553_v13 = vsel %vm550_vm4, %v552_v10, %v548_v12  ;;  %vm562_vm8 = vmor %vm560_vm6, %vm561_vm5  ;;  %v533_v33 = vsel %vm532_vm12, %v1054_v4, %v529_v26  ;;  %758 = vmatpush.msra.mxu0 %v736_v51  ;;  %v735_v4 = vld [vmem:[#allocation3 + $0x20] sm:$0xff]  ;;  %v1041_v26 = vld [vmem:[%s1502_s18] ss:$0 sm:$0xff] }
 0x3f0   :  { %v557_v14 = vsub.f32 1.0, %v556_v11  ;;  %v554_v15 = vmul.f32 %v1048_v55, %v553_v13  ;;  %v538_v35 = vsel %vm535_vm13, %v537_v34, %v533_v33  ;;  %v694_v55 = vld [vmem:[#allocation5] sm:$0xff] }
 0x3f1   :  { %v539_v36 = vmul.f32 %v1393_v58, %v538_v35  ;;  %v841_v58 = vld [vmem:[#allocation5 + $0x58] sm:$0xff]  ;;  %759 = vmatpush.msra.mxu0 %v735_v4 }
 0x3f2   :  { %v558_v18 = vmul.f32 %v1056_v9, %v557_v14  ;;  %611 = vperm.xlu2 %1034, %v554_v15  }
 0x3f4   :  { %v559_v20 = vadd.f32 %v1056_v9, %v558_v18 }
 0x3f6   :  { %v563_v22 = vsel %vm562_vm8, %v1056_v9, %v559_v20 }
 0x3f7   :  { %v568_v30 = vsel %vm565_vm9, %v567_v21, %v563_v22 }
 0x3f8   :  { %v569_v31 = vmul.f32 %v1385_v53, %v568_v30  ;;  %v696_v53 = vld [vmem:[#allocation5 + $0x10] sm:$0xff] }
 0x3fa   :  { %616 = vperm.xlu0 %1032, %v569_v31  }
 0x402   :  { %606 = vperm.xlu0 %1032, %v539_v36  }
 0x44c   :  { %v612_v42 = vpop.permute.xlu2 %611 }
 0x44d   :  { %v620_v47 = vmul.f32 %v612_v42, %v599_v45  ;;  %v1044_v42 = vld [vmem:[%s1502_s18 + $0x1] ss:$0 sm:$0xff] }
 0x46c   :  { %v617_v43 = vpop.permute.xlu0 %616 }
 0x46d   :  { %v621_v46 = vmul.f32 %v617_v43, %v602_v41 }
 0x46f   :  { %635 = vmatpush.msra.mxu2 %v621_v46 }
 0x471   :  { %636 = vmatpush.msra.mxu2 %v620_v47 }
 0x474   :  { %v607_v49 = vpop.permute.xlu0 %606 }
 0x475   :  { %v619_v50 = vmul.f32 %v607_v49, %v596_v48 }
 0x477   :  { %637 = vmatpush.msra.mxu2 %v619_v50 }
 0x478   :  { %1002 = vmatmul.msk.f32.vlgmr.msra.gmra.mxu2 %vm466_vm1, %v1391_v56  ;;  %v660_v56 = vld [vmem:[#allocation3 + $0x18] sm:$0xff] }
 0x479   :  { %715 = vmatpush.msrb.mxu2 %v697_v52  ;;  %683 = vmatpush.msra.mxu1 %v660_v56 }
 0x47b   :  { %716 = vmatpush.msrb.mxu2 %v696_v53  ;;  %684 = vmatpush.msra.mxu1 %v659_v0 }
 0x47d   :  { %717 = vmatpush.msrb.mxu2 %v695_v54  ;;  %685 = vmatpush.msra.mxu1 %v658_v2  ;;  %v1039_v2 = vld [vmem:[%s1502_s18 + $0x2] ss:$0 sm:$0xff] }
 0x47f   :  { %718 = vmatpush.msrb.mxu2 %v694_v55  ;;  %686 = vmatpush.msra.mxu1 %v657_v3 }
 0x480   :  { %1003 = vmatmul.msk.f32.gmra.mxu2 %vm466_vm1, %v1413_v63  ;;  %v808_v63 = vld [vmem:[#allocation3 + $0x58] sm:$0xff] }
 0x481   :  { %859 = vmatpush.msra.mxu2 %v841_v58  ;;  %826 = vmatpush.msrb.mxu3 %v808_v63 }
 0x482   :  { %784 = vmatpush.msrb.mxu1 %v771_v6 }
 0x483   :  { %860 = vmatpush.msra.mxu2 %v840_v59  ;;  %827 = vmatpush.msrb.mxu3 %v807_v44 }
 0x484   :  { %785 = vmatpush.msrb.mxu1 %v770_v7 }
 0x485   :  { %861 = vmatpush.msra.mxu2 %v839_v60  ;;  %828 = vmatpush.msrb.mxu3 %v806_v57 }
 0x486   :  { %786 = vmatpush.msrb.mxu1 %v769_v8 }
 0x487   :  { %862 = vmatpush.msra.mxu2 %v838_v61  ;;  %829 = vmatpush.msrb.mxu3 %v805_v5 }
 0x488   :  { %1008 = vmatmul.msk.f32.vlgmr.msrb.gmra.mxu2 %vm326_vm7, %v1306_v25  ;;  %787 = vmatpush.msrb.mxu1 %v768_v24  ;;  %v1043_v24 = vld [vmem:[%s1501_s17 + $0x2] ss:$0 sm:$0xff] }
 0x490   :  { %1009 = vmatmul.msk.f32.gmra.mxu2 %vm326_vm7, %v1297_v23 }
 0x498   :  { %1020 = vmatmul.msk.f32.vlgmr.msra.gmra.mxu2 %vm326_vm7, %v1306_v25 }
 0x4a0   :  { %1021 = vmatmul.msk.f32.gmra.mxu2 %vm326_vm7, %v1297_v23 }
 0x4fb   :  { %v639_v27 = vpop.f32.mrf.mxu2 }
 0x4fc   :  { %v647_v9 = vmin.f32 %v639_v27, 0.0  ;;  %vm645_vm14 = vcmp.gt.f32.partialorder %v639_v27, 0.0 }
 0x4fe   :  { %v649_v10 = vmul.f32 1.442695, %v647_v9 }
 0x500   :  { %1057 = vpow2.f32 %v649_v10 }
 0x503   :  { %v642_v28 = vpop.f32.mrf.mxu2 }
 0x504   :  { %v648_v11 = vmin.f32 %v642_v28, 0.0  ;;  %vm646_vm15 = vcmp.gt.f32.partialorder %v642_v28, 0.0 }
 0x506   :  { %v1058_v12 = vpop.eup %1057  ;;  %v651_v13 = vmul.f32 1.442695, %v648_v11 }
 0x507   :  { %v1004_v14 = vadd.f32 -1.0, %v1058_v12 }
 0x508   :  { %1059 = vpow2.f32 %v651_v13 }
 0x509   :  { %v655_v15 = vsel %vm645_vm14, %v639_v27, %v1004_v14 }
 0x50a   :  { %1006 = vmatmul.msk.f32.vlgmr.msra.gmra.mxu1 %vm326_vm7, %v655_v15  ;;  %1011 = vmatmul.msk.f32.vlgmr.msra.gmra.mxu0 %vm326_vm7, %v655_v15 }
 0x50b   :  { %1017 = vmatmul.msk.f32.vlgmr.msrb.gmra.mxu3 %vm326_vm7, %v655_v15  ;;  %v720_v20 = vpop.f32.mrf.mxu2 }
 0x50e   :  { %v1060_v16 = vpop.eup %1059 }
 0x50f   :  { %v1005_v17 = vadd.f32 -1.0, %v1060_v16 }
 0x511   :  { %v656_v18 = vsel %vm646_vm15, %v642_v28, %v1005_v17 }
 0x512   :  { %1007 = vmatmul.msk.f32.gmra.mxu1 %vm326_vm7, %v656_v18  ;;  %1012 = vmatmul.msk.f32.gmra.mxu0 %vm326_vm7, %v656_v18 }
 0x513   :  { %1018 = vmatmul.msk.f32.gmra.mxu3 %vm326_vm7, %v656_v18  ;;  %v723_v34 = vpop.f32.mrf.mxu2 }
 0x51a   :  { %1013 = vmatmul.msk.f32.vlgmr.msrb.gmra.mxu1 %vm326_vm7, %v1306_v25 }
 0x51b   :  { %v864_v63 = vpop.f32.mrf.mxu2 }
 0x51c   :  { %v865_v8 = vadd.f32 %v1039_v2, %v864_v63 }
 0x522   :  { %1014 = vmatmul.msk.f32.gmra.mxu1 %vm326_vm7, %v1297_v23 }
 0x523   :  { %v867_v17 = vpop.f32.mrf.mxu2 }
 0x587   :  { %v688_v21 = vpop.f32.mrf.mxu1  ;;  %v761_v35 = vpop.f32.mrf.mxu0 }
 0x588   :  { %v689_v22 = vadd.f32 %v1040_v19, %v688_v21  ;;  %v762_v41 = vadd.f32 %v1042_v37, %v761_v35 }
 0x58a   :  { %v726_v29 = vadd.f32 %v720_v20, %v689_v22 }
 0x58c   :  { %v732_v30 = vadd.f32 %v1041_v26, %v726_v29  ;;  %v868_v29 = vadd.f32 %v1039_v2, %v867_v17 }
 0x58e   :  { %v1022_v31 = vmul.f32 -1.442695, %v732_v30  ;;  %v831_v5 = vpop.f32.mrf.mxu3 }
 0x58f   :  { %v691_v32 = vpop.f32.mrf.mxu1  ;;  %v764_v48 = vpop.f32.mrf.mxu0  ;;  %v832_v15 = vadd.f32 %v1043_v24, %v831_v5 }
 0x590   :  { %1061 = vpow2.f32 %v1022_v31  ;;  %v692_v33 = vadd.f32 %v1040_v19, %v691_v32  ;;  %v765_v52 = vadd.f32 %v1042_v37, %v764_v48 }
 0x592   :  { %v727_v36 = vadd.f32 %v723_v34, %v692_v33 }
 0x594   :  { %v733_v38 = vadd.f32 %v1041_v26, %v727_v36 }
 0x596   :  { %v1062_v39 = vpop.eup %1061  ;;  %v1023_v40 = vmul.f32 -1.442695, %v733_v38  ;;  %v834_v34 = vpop.f32.mrf.mxu3 }
 0x597   :  { %v876_v43 = vadd.f32 1.0, %v1062_v39  ;;  %v789_v45 = vpop.f32.mrf.mxu1  ;;  %v835_v39 = vadd.f32 %v1043_v24, %v834_v34 }
 0x598   :  { %1063 = vpow2.f32 %v1023_v40  ;;  %v795_v46 = vadd.f32 %v789_v45, %v762_v41 }
 0x599   :  { %1065 = vrcp.f32 %v876_v43  ;;  %v889_v56 = vand.u32 2147483648, %v876_v43  ;;  %v887_v1 = vand.u32 2147483647, %v876_v43  ;;  %vm883_vm0 = vweird.f32 %v876_v43 }
 0x59a   :  { %v802_v47 = vadd.f32 %v1044_v42, %v795_v46 }
 0x59b   :  { %v890_v4 = vor.u32 1.1754944e-38, %v889_v56  ;;  %vm888_vm2 = vcmp.eq.f32.partialorder %v887_v1, 8.507059e+37 }
 0x59c   :  { %v1024_v49 = vmul.f32 -1.442695, %v802_v47 }
 0x59e   :  { %v1064_v50 = vpop.eup %1063  ;;  %1067 = vpow2.f32 %v1024_v49 }
 0x59f   :  { %v1066_v53 = vpop.eup %1065  ;;  %v877_v54 = vadd.f32 1.0, %v1064_v50  ;;  %v792_v55 = vpop.f32.mrf.mxu1 }
 0x5a0   :  { %v879_v58 = vmul.f32 %v1066_v53, %v876_v43  ;;  %v796_v59 = vadd.f32 %v792_v55, %v765_v52  ;;  %vm884_vm1 = vweird.f32 %v1066_v53 }
 0x5a1   :  { %1069 = vrcp.f32 %v877_v54  ;;  %vm885_vm3 = vmor %vm883_vm0, %vm884_vm1  ;;  %v904_v28 = vand.u32 2147483648, %v877_v54  ;;  %v902_v13 = vand.u32 2147483647, %v877_v54  ;;  %vm898_vm5 = vweird.f32 %v877_v54 }
 0x5a2   :  { %v880_v60 = vsub.f32 1.0, %v879_v58  ;;  %v803_v61 = vadd.f32 %v1044_v42, %v796_v59  ;;  %vm963_vm0 = vcmask 257024  }
 0x5a3   :  { %v905_v21 = vor.u32 1.1754944e-38, %v904_v28  ;;  %vm903_vm8 = vcmp.eq.f32.partialorder %v902_v13, 8.507059e+37 }
 0x5a4   :  { %v1068_v62 = vpop.eup %1067  ;;  %v881_v0 = vmul.f32 %v1066_v53, %v880_v60  ;;  %v1025_v44 = vmul.f32 -1.442695, %v803_v61 }
 0x5a5   :  { %v914_v51 = vadd.f32 1.0, %v1068_v62 }
 0x5a6   :  { %v882_v57 = vadd.f32 %v1066_v53, %v881_v0  ;;  %1071 = vpow2.f32 %v1025_v44 }
 0x5a7   :  { %v1070_v3 = vpop.eup %1069  ;;  %1073 = vrcp.f32 %v914_v51  ;;  %v927_v30 = vand.u32 2147483648, %v914_v51  ;;  %v925_v33 = vand.u32 2147483647, %v914_v51  ;;  %vm921_vm10 = vweird.f32 %v914_v51 }
 0x5a8   :  { %v886_v6 = vsel %vm885_vm3, %v1066_v53, %v882_v57  ;;  %v894_v7 = vmul.f32 %v1070_v3, %v877_v54  ;;  %vm899_vm4 = vweird.f32 %v1070_v3 }
 0x5a9   :  { %v891_v27 = vsel %vm888_vm2, %v890_v4, %v886_v6  ;;  %vm900_vm6 = vmor %vm898_vm5, %vm899_vm4  ;;  %v928_v38 = vor.u32 1.1754944e-38, %v927_v30  ;;  %vm926_vm12 = vcmp.eq.f32.partialorder %v925_v33, 8.507059e+37 }
 0x5aa   :  { %v895_v9 = vsub.f32 1.0, %v894_v7  ;;  %v946_v10 = vmul.f32 %v891_v27, %v865_v8 }
 0x5ac   :  { %v1072_v11 = vpop.eup %1071  ;;  %v896_v12 = vmul.f32 %v1070_v3, %v895_v9  ;;  %v948_v20 = vadd.f32 %v946_v10, %v832_v15 }
 0x5ad   :  { %v1074_v14 = vpop.eup %1073  ;;  %v915_v16 = vadd.f32 1.0, %v1072_v11 }
 0x5ae   :  { %v917_v18 = vmul.f32 %v1074_v14, %v914_v51  ;;  %v897_v19 = vadd.f32 %v1070_v3, %v896_v12  ;;  %vm922_vm9 = vweird.f32 %v1074_v14 }
 0x5af   :  { %1075 = vrcp.f32 %v915_v16  ;;  %vm923_vm11 = vmor %vm921_vm10, %vm922_vm9  ;;  %v940_v48 = vand.u32 2147483647, %v915_v16  ;;  %v942_v49 = vand.u32 2147483648, %v915_v16  ;;  %vm936_vm14 = vweird.f32 %v915_v16 }
 0x5b0   :  { %v918_v22 = vsub.f32 1.0, %v917_v18  ;;  %v901_v26 = vsel %vm900_vm6, %v1070_v3, %v897_v19  ;;  %1077 = vtanh.f32 %v948_v20 }
 0x5b1   :  { %v906_v31 = vsel %vm903_vm8, %v905_v21, %v901_v26  ;;  %v943_v58 = vor.u32 1.1754944e-38, %v942_v49  ;;  %vm941_vm1 = vcmp.eq.f32.partialorder %v940_v48, 8.507059e+37 }
 0x5b2   :  { %v919_v32 = vmul.f32 %v1074_v14, %v918_v22  ;;  %v947_v35 = vmul.f32 %v906_v31, %v868_v29 }
 0x5b4   :  { %v920_v36 = vadd.f32 %v1074_v14, %v919_v32  ;;  %v949_v43 = vadd.f32 %v947_v35, %v835_v39 }
 0x5b5   :  { %v1076_v37 = vpop.eup %1075 }
 0x5b6   :  { %v924_v40 = vsel %vm923_vm11, %v1074_v14, %v920_v36  ;;  %v932_v41 = vmul.f32 %v1076_v37, %v915_v16  ;;  %v1078_v47 = vpop.eup %1077  ;;  %vm937_vm13 = vweird.f32 %v1076_v37  ;;  %1079 = vtanh.f32 %v949_v43 }
 0x5b7   :  { %v929_v42 = vsel %vm926_vm12, %v928_v38, %v924_v40  ;;  %vm938_vm15 = vmor %vm936_vm14, %vm937_vm13 }
 0x5b8   :  { %v952_v45 = vsub.f32 1.0, %v929_v42  ;;  %v933_v46 = vsub.f32 1.0, %v932_v41  ;;  %v956_v52 = vmul.f32 %v929_v42, %v1306_v25 }
 0x5ba   :  { %v954_v50 = vmul.f32 %v1078_v47, %v952_v45  ;;  %v934_v53 = vmul.f32 %v1076_v37, %v933_v46 }
 0x5bc   :  { %v958_v54 = vadd.f32 %v956_v52, %v954_v50  ;;  %v935_v55 = vadd.f32 %v1076_v37, %v934_v53  ;;  %v1080_v62 = vpop.eup %1079 }
 0x5be   :  { %v960_v59 = vmax.f32 %v958_v54, 0.0  ;;  %v939_v60 = vsel %vm938_vm15, %v1076_v37, %v935_v55 }
 0x5bf   :  { %v944_v61 = vsel %vm941_vm1, %v943_v58, %v939_v60 }
 0x5c0   :  { %962 = vst.msk [vmem:[%s1503_s19] sm:$0xff] %vm326_vm7, %v960_v59  ;;  %v953_v56 = vsub.f32 1.0, %v944_v61  ;;  %v957_v63 = vmul.f32 %v944_v61, %v1297_v23 }
 0x5c2   :  { %v955_v25 = vmul.f32 %v1080_v62, %v953_v56 }
 0x5c4   :  { %v959_v0 = vadd.f32 %v957_v63, %v955_v25 }
 0x5c6   :  { %v961_v1 = vmax.f32 %v959_v0, 0.0 }
 0x5c8   :  { %964 = vst.msk [vmem:[%s1503_s19 + $0x8] sm:$0xf] %vm963_vm0, %v961_v1 }
 0x5c9   :  { %969 = vsyncpa [#allocation4], 1 }
 0x5ca   :  { %970 = vsyncpa [#allocation6], 1 }

// kernel: attentive_fp_forward.4
= control target key start
LH: loop header
LB: loop body
LE: loop exit
PB: predicated region body
PF: predicated region fallthrough
CT: control target
= control target key end

     0   :  { %s1433_s0 = inlined_call_operand.vmem [shape: f32[12,32], index: 0, kind: input, shape index: {}]   ;;  %s1434_s1 = inlined_call_operand.vmem [shape: f32[12,32], index: 1, kind: input, shape index: {}]   ;;  %s1435_s2 = inlined_call_operand.vmem [shape: f32[24,12], index: 2, kind: input, shape index: {}]   ;;  %s1436_s3 = inlined_call_operand.vmem [shape: f32[24,12], index: 3, kind: input, shape index: {}]   ;;  %s1437_s4 = inlined_call_operand.vmem [shape: f32[12,24], index: 4, kind: input, shape index: {}]   ;;  %s1438_s5 = inlined_call_operand.vmem [shape: f32[32,1], index: 5, kind: input, shape index: {}]   ;;  %s1439_s6 = inlined_call_operand.vmem [shape: f32[32,1], index: 6, kind: input, shape index: {}]   ;;  %s1440_s7 = inlined_call_operand.<no memory space> [shape: f32[1,1], index: 7, kind: input, shape index: {}]   ;;  %s1441_s8 = inlined_call_operand.vmem [shape: f32[32,32], index: 8, kind: input, shape index: {}]   ;;  %s1442_s9 = inlined_call_operand.vmem [shape: f32[1,32], index: 9, kind: input, shape index: {}]   ;;  %s1443_s10 = inlined_call_operand.hbm [shape: f32[3,32,32], index: 10, kind: input, shape index: {}]   ;;  %s1444_s11 = inlined_call_operand.hbm [shape: f32[3,32,32], index: 11, kind: input, shape index: {}]   ;;  %s1445_s12 = inlined_call_operand.vmem [shape: f32[3,1,32], index: 12, kind: input, shape index: {}]   ;;  %s1446_s13 = inlined_call_operand.vmem [shape: f32[3,1,32], index: 13, kind: input, shape index: {}]   ;;  %s1447_s14 = inlined_call_operand.vmem [shape: f32[1,32], index: 14, kind: input, shape index: {}]   ;;  %s1448_s15 = inlined_call_operand.vmem [shape: f32[1,32], index: 15, kind: input, shape index: {}]   ;;  %s1449_s16 = inlined_call_operand.hbm [shape: f32[12,32], index: 16, kind: output, shape index: {0}]   ;;  %s1450_s17 = inlined_call_operand.vmem [shape: f32[12,32], index: 17, kind: output, shape index: {1}]  }
   0x1   :  { %1453 = sst [smem:[#allocation12_spill]] %s1433_s0  ;;  %v23_v0 = vstv %s1440_s7 }
   0x2   :  { %1454 = sst [smem:[#allocation13_spill]] %s1434_s1  ;;  %24 = vst [vmem:[#allocation2] sm:$0x1] %v23_v0 }
   0x3   :  { %25 = vsyncpa [#allocation4], 0 }
   0x4   :  { %26 = vsyncpa [#allocation7], 0 }
   0x5   :  { %27 = vsyncpa [#allocation5], 0  ;;  %s52_s28 = sshll.u32 %s1443_s10, 4  ;;  %s1077_s29 = smov [#allocation3]   ;;  %s53_s28 = int_to_ptr.hbm [resolvable:$true] %s52_s28 }
   0x6   :  { %s54_s0 = sshll.u32 %s1077_s29, 4  ;;  %s65_s19 = sshll.u32 %s1444_s11, 4  ;;  %s55_s0 = int_to_ptr.vmem [resolvable:$true] %s54_s0  ;;  %s66_s19 = int_to_ptr.hbm [resolvable:$true] %s65_s19 }
   0x7   :  { %s1078_s1 = smov 128   ;;  %s1079_s20 = smov 8  }
   0x8   :  { %60 = dma.hbm_to_vmem [thread:$0]  %s53_s28, 1536, %s55_s0, [#allocation4], %s1078_s1, %s1078_s1, %s1079_s20  }
   0x9   :  { %s1080_s7 = smov [#allocation6]  }
   0xa   :  { %s67_s21 = sshll.u32 %s1080_s7, 4  ;;  %s68_s21 = int_to_ptr.vmem [resolvable:$true] %s67_s21 }
   0xb   :  { %73 = dma.hbm_to_vmem [thread:$0]  %s66_s19, 1536, %s68_s21, [#allocation7], %s1078_s1, %s1078_s1, %s1079_s20  }
   0xc   :  { %1071 = dma.done.wait [#allocation4], 1536  }
   0xd   :  { %1072 = vsyncadd [#allocation4], 4294965760 }
   0xe   :  { %1073 = dma.done.wait [#allocation7], 1536  }
   0xf   :  { %1074 = vsyncadd [#allocation7], 4294965760  ;;  %vm110_vm0 = vcmask 1043456   ;;  %s1455_s22 = sld [smem:[#allocation12_spill]]  ;;  %v1205_v3 = vld [vmem:[%s1436_s3] sm:$0xff]  ;;  %vm100_vm1 = vcmask 97280  }
  0x10   :  { %v1210_v4 = vld [vmem:[%s1435_s2] sm:$0xff]  ;;  %v182_v5 = vld [vmem:[%s1439_s6 + $0x18] sm:$0xff]  ;;  %v181_v7 = vld [vmem:[%s1439_s6 + $0x10] sm:$0xff]  ;;  %vm183_vm2 = vcmask 261120   ;;  %v1081_v23 = vmov 0   ;;  %vm270_vm7 = vcmp.gt.f32.partialorder %v1205_v3, 0.5 }
  0x11   :  { %v178_v6 = vld [vmem:[%s1438_s5 + $0x18] sm:$0xff]  ;;  %v177_v8 = vld [vmem:[%s1438_s5 + $0x10] sm:$0xff]  ;;  %v180_v9 = vld [vmem:[%s1439_s6 + $0x8] sm:$0xff]  ;;  %205 = vmatpush.msra.mxu2 %v182_v5  ;;  %950 = vset.pattern.permute.xlu0 %v1081_v23  ;;  %vm323_vm9 = vcmask 195584   ;;  %s1458_s24 = sld [smem:[#allocation13_spill]]  ;;  %s872_s28 = sshll.u32 %s1449_s16, 4  ;;  %s873_s28 = int_to_ptr.hbm [resolvable:$true] %s872_s28 }
  0x12   :  { %v176_v10 = vld [vmem:[%s1438_s5 + $0x8] sm:$0xff]  ;;  %240 = vmatpush.msra.mxu3 %v178_v6  ;;  %v1253_v13 = vld [vmem:[%s1436_s3 + $0x10] sm:$0xff]  ;;  %v179_v15 = vld [vmem:[%s1439_s6] sm:$0xff]  ;;  %951 = vset.pattern.permute.xlu1 %v1081_v23 }
  0x13   :  { %206 = vmatpush.msra.mxu2 %v181_v7  ;;  %v1239_v11 = vld [vmem:[%s1436_s3 + $0x8] sm:$0xff]  ;;  %v1258_v14 = vld [vmem:[%s1435_s2 + $0x10] sm:$0xff]  ;;  %v175_v16 = vld [vmem:[%s1438_s5] sm:$0xff]  ;;  %952 = vset.pattern.permute.xlu2 %v1081_v23  ;;  %vm272_vm8 = vcmp.gt.f32.partialorder %v1253_v13, 0.5 }
  0x14   :  { %241 = vmatpush.msra.mxu3 %v177_v8  ;;  %v1244_v12 = vld [vmem:[%s1435_s2 + $0x8] sm:$0xff]  ;;  %v953_v24 = vld [vmem:[#allocation2] ss:$0 sm:$0xff]  ;;  %vm271_vm6 = vcmp.gt.f32.partialorder %v1239_v11, 0.5  ;;  %v430_v6 = vld [vmem:[%s1441_s8 + $0x18] sm:$0xff] }
  0x15   :  { %v1191_v1 = vld [vmem:[%s1455_s22 + $0x8] sm:$0xf]  ;;  %v1196_v2 = vld [vmem:[%s1455_s22] sm:$0xff]  ;;  %207 = vmatpush.msra.mxu2 %v180_v9  ;;  %v429_v7 = vld [vmem:[%s1441_s8 + $0x10] sm:$0xff] }
  0x16   :  { %890 = vmatpush.msk.msra.mxu0 %vm110_vm0, %v1191_v1  ;;  %894 = vmatpush.msk.msra.mxu1 %vm110_vm0, %v1191_v1  ;;  %v428_v8 = vld [vmem:[%s1441_s8 + $0x8] sm:$0xff] }
  0x17   :  { %242 = vmatpush.msra.mxu3 %v176_v10  ;;  %208 = vmatpush.msra.mxu2 %v179_v15 }
  0x18   :  { %129 = vmatpush.msra.mxu0 %v1196_v2  ;;  %164 = vmatpush.msra.mxu1 %v1196_v2 }
  0x19   :  { %891 = vmatmul.msk.f32.vlgmr.msra.gmra.mxu0 %vm100_vm1, %v1205_v3  ;;  %895 = vmatmul.msk.f32.vlgmr.msra.gmra.mxu1 %vm100_vm1, %v1210_v4 }
  0x1a   :  { %243 = vmatpush.msra.mxu3 %v175_v16  ;;  %452 = vmatpush.msrb.mxu2 %v430_v6 }
  0x1c   :  { %453 = vmatpush.msrb.mxu2 %v429_v7 }
  0x1e   :  { %454 = vmatpush.msrb.mxu2 %v428_v8 }
  0x21   :  { %892 = vmatmul.msk.f32.gmra.mxu0 %vm100_vm1, %v1239_v11  ;;  %896 = vmatmul.msk.f32.gmra.mxu1 %vm100_vm1, %v1244_v12 }
  0x29   :  { %893 = vmatmul.msk.f32.gmra.mxu0 %vm100_vm1, %v1253_v13  ;;  %897 = vmatmul.msk.f32.gmra.mxu1 %vm100_vm1, %v1258_v14 }
  0x96   :  { %v131_v17 = vpop.f32.mrf.mxu0  ;;  %v166_v18 = vpop.f32.mrf.mxu1 }
  0x97   :  { %898 = vmatmul.msk.f32.vlgmr.msra.gmra.mxu2 %vm183_vm2, %v166_v18  ;;  %901 = vmatmul.msk.f32.vlgmr.msra.gmra.mxu3 %vm183_vm2, %v131_v17  ;;  %v427_v17 = vld [vmem:[%s1441_s8] sm:$0xff] }
  0x98   :  { %455 = vmatpush.msrb.mxu2 %v427_v17 }
  0x9e   :  { %v134_v19 = vpop.f32.mrf.mxu0  ;;  %v169_v20 = vpop.f32.mrf.mxu1 }
  0x9f   :  { %899 = vmatmul.msk.f32.gmra.mxu2 %vm183_vm2, %v169_v20  ;;  %902 = vmatmul.msk.f32.gmra.mxu3 %vm183_vm2, %v134_v19 }
  0xa6   :  { %v137_v21 = vpop.f32.mrf.mxu0  ;;  %v172_v22 = vpop.f32.mrf.mxu1 }
  0xa7   :  { %900 = vmatmul.msk.f32.gmra.mxu2 %vm183_vm2, %v172_v22  ;;  %903 = vmatmul.msk.f32.gmra.mxu3 %vm183_vm2, %v137_v21 }
  0xaf   :  { %910 = vmatmul.msk.f32.vlgmr.msrb.gmra.mxu2 %vm183_vm2, %v1196_v2 }
  0xb7   :  { %911 = vmatmul.msk.f32.gmra.mxu2 %vm183_vm2, %v1191_v1 }
 0x11a   :  { %v210_v25 = vpop.f32.mrf.mxu2  ;;  %v245_v26 = vpop.f32.mrf.mxu3 }
 0x11b   :  { %v246_v27 = vadd.f32 %v245_v26, %v210_v25  ;;  %v1319_v25 = vld [vmem:[%s1437_s4] sm:$0xff] }
 0x11d   :  { %v258_v28 = vadd.f32 %v953_v24, %v246_v27  ;;  %v1329_v27 = vld [vmem:[%s1437_s4 + $0x8] sm:$0xf] }
 0x11f   :  { %vm261_vm3 = vcmp.gt.f32.partialorder %v258_v28, 0.0  ;;  %v264_v29 = vmul.f32 0.01, %v258_v28 }
 0x121   :  { %v1276_v30 = vsel %vm261_vm3, %v258_v28, %v264_v29 }
 0x122   :  { %v213_v31 = vpop.f32.mrf.mxu2  ;;  %275 = vperm.xlu0 %950, %v1276_v30   ;;  %v248_v32 = vpop.f32.mrf.mxu3 }
 0x123   :  { %v249_v33 = vadd.f32 %v248_v32, %v213_v31 }
 0x125   :  { %v259_v34 = vadd.f32 %v953_v24, %v249_v33 }
 0x127   :  { %vm262_vm4 = vcmp.gt.f32.partialorder %v259_v34, 0.0  ;;  %v265_v35 = vmul.f32 0.01, %v259_v34 }
 0x129   :  { %v268_v36 = vsel %vm262_vm4, %v259_v34, %v265_v35 }
 0x12a   :  { %v216_v37 = vpop.f32.mrf.mxu2  ;;  %280 = vperm.xlu0 %950, %v268_v36   ;;  %v251_v38 = vpop.f32.mrf.mxu3 }
 0x12b   :  { %v252_v39 = vadd.f32 %v251_v38, %v216_v37 }
 0x12d   :  { %v260_v40 = vadd.f32 %v953_v24, %v252_v39 }
 0x12f   :  { %vm263_vm5 = vcmp.gt.f32.partialorder %v260_v40, 0.0  ;;  %v266_v41 = vmul.f32 0.01, %v260_v40 }
 0x131   :  { %v269_v42 = vsel %vm263_vm5, %v260_v40, %v266_v41 }
 0x132   :  { %285 = vperm.xlu1 %951, %v269_v42   ;;  %v457_v28 = vpop.f32.mrf.mxu2 }
 0x13a   :  { %v460_v31 = vpop.f32.mrf.mxu2 }
 0x194   :  { %v276_v43 = vpop.permute.xlu0 %275 }
 0x195   :  { %v288_v46 = vsel %vm270_vm7, %v276_v43, -inf }
 0x196   :  { %v291_v48 = vsel %vm100_vm1, %v288_v46, -inf }
 0x19c   :  { %v281_v44 = vpop.permute.xlu0 %280 }
 0x19d   :  { %v289_v45 = vsel %vm271_vm6, %v281_v44, -inf }
 0x19e   :  { %v292_v47 = vsel %vm100_vm1, %v289_v45, -inf }
 0x19f   :  { %v294_v50 = vmax.f32 %v291_v48, %v292_v47 }
 0x1a4   :  { %v286_v49 = vpop.permute.xlu1 %285 }
 0x1a5   :  { %v290_v51 = vsel %vm272_vm8, %v286_v49, -inf }
 0x1a6   :  { %v293_v52 = vsel %vm100_vm1, %v290_v51, -inf }
 0x1a7   :  { %v295_v53 = vmax.f32 %v294_v50, %v293_v52 }
 0x1a9   :  { %v296_v54 = vrot.slane %v295_v53, 4 }
 0x1ab   :  { %v297_v55 = vmax.f32 %v295_v53, %v296_v54 }
 0x1ad   :  { %v298_v56 = vrot.slane %v297_v55, 2 }
 0x1af   :  { %v299_v57 = vmax.f32 %v297_v55, %v298_v56 }
 0x1b1   :  { %v300_v58 = vrot.slane %v299_v57, 1 }
 0x1b3   :  { %v301_v59 = vmax.f32 %v299_v57, %v300_v58 }
 0x1b5   :  { %v304_v60 = vsel %vm272_vm8, %v301_v59, 0.0  ;;  %v303_v61 = vsel %vm271_vm6, %v301_v59, 0.0  ;;  %v302_v0 = vsel %vm270_vm7, %v301_v59, 0.0 }
 0x1b6   :  { %v311_v62 = vsel %vm100_vm1, %v304_v60, 0.0  ;;  %v308_v63 = vsel %vm100_vm1, %v303_v61, 0.0  ;;  %v305_v5 = vsel %vm100_vm1, %v302_v0, 0.0 }
 0x1b7   :  { %312 = vadd.xlane.f32.xlu1 %v311_v62  ;;  %309 = vadd.xlane.f32.xlu2 %v308_v63 }
 0x1bf   :  { %306 = vadd.xlane.f32.xlu2 %v305_v5 }
 0x22a   :  { %v313_v9 = vpop.xlane.xlu1 %312  ;;  %v310_v10 = vpop.xlane.xlu2 %309 }
 0x22b   :  { %v316_v15 = vsub.f32 %v269_v42, %v313_v9  ;;  %v315_v16 = vsub.f32 %v268_v36, %v310_v10 }
 0x22d   :  { %v321_v18 = vmul.f32 1.442695, %v316_v15  ;;  %v319_v19 = vmul.f32 1.442695, %v315_v16 }
 0x22f   :  { %963 = vpow2.f32 %v321_v18  ;;  %v585_v18 = vld [vmem:[#allocation6 + $0x18] sm:$0xff] }
 0x230   :  { %965 = vpow2.f32 %v319_v19  ;;  %v584_v19 = vld [vmem:[#allocation6 + $0x10] sm:$0xff] }
 0x232   :  { %v307_v20 = vpop.xlane.xlu2 %306 }
 0x233   :  { %v314_v21 = vsub.f32 %v1276_v30, %v307_v20  ;;  %v954_v30 = vld [vmem:[%s1442_s9] ss:$0 sm:$0xff]  ;;  %v583_v20 = vld [vmem:[#allocation6 + $0x8] sm:$0xff] }
 0x234   :  { %v458_v32 = vadd.f32 %v954_v30, %v457_v28  ;;  %v461_v33 = vadd.f32 %v954_v30, %v460_v31  ;;  %v545_v28 = vld [vmem:[#allocation3] sm:$0xff]  ;;  %v654_v30 = vld [vmem:[#allocation6 + $0x38] sm:$0xff]  ;;  %v653_v31 = vld [vmem:[#allocation6 + $0x30] sm:$0xff] }
 0x235   :  { %v1311_v22 = vpop.eup %963  ;;  %v317_v23 = vmul.f32 1.442695, %v314_v21  ;;  %v582_v21 = vld [vmem:[#allocation6] sm:$0xff] }
 0x236   :  { %343 = vmatpush.msrb.mxu0 %v1311_v22  ;;  %v966_v24 = vpop.eup %965  ;;  %912 = vmatpush.msk.msrb.mxu3 %vm110_vm0, %v461_v33  ;;  %v651_v33 = vld [vmem:[#allocation6 + $0x20] sm:$0xff] }
 0x237   :  { %967 = vpow2.f32 %v317_v23  ;;  %v621_v23 = vld [vmem:[#allocation3 + $0x38] sm:$0xff] }
 0x238   :  { %344 = vmatpush.msrb.mxu0 %v966_v24  ;;  %481 = vmatpush.msrb.mxu3 %v458_v32  ;;  %v652_v32 = vld [vmem:[#allocation6 + $0x28] sm:$0xff] }
 0x239   :  { %913 = vmatmul.msk.f32.vlgmr.msrb.gmra.mxu3 %vm100_vm1, %v1210_v4 }
 0x23a   :  { %940 = vmatpush.msra.mxu3 %v585_v18 }
 0x23c   :  { %941 = vmatpush.msra.mxu3 %v584_v19 }
 0x23d   :  { %v1321_v26 = vpop.eup %967 }
 0x23e   :  { %345 = vmatpush.msrb.mxu0 %v1321_v26  ;;  %942 = vmatpush.msra.mxu3 %v583_v20 }
 0x23f   :  { %904 = vmatmul.msk.f32.vlgmr.msrb.gmra.mxu0 %vm323_vm9, %v1319_v25 }
 0x240   :  { %943 = vmatpush.msra.mxu3 %v582_v21 }
 0x241   :  { %914 = vmatmul.msk.f32.gmra.mxu3 %vm100_vm1, %v1244_v12 }
 0x242   :  { %639 = vmatpush.msrb.mxu3 %v621_v23 }
 0x247   :  { %905 = vmatmul.msk.f32.gmra.mxu0 %vm323_vm9, %v1329_v27 }
 0x249   :  { %915 = vmatmul.msk.f32.gmra.mxu3 %vm100_vm1, %v1258_v14 }
 0x251   :  { %923 = vmatmul.msk.f32.vlgmr.msra.gmra.mxu3 %vm183_vm2, %v1191_v1 }
 0x2bc   :  { %v347_v29 = vpop.f32.mrf.mxu0  ;;  %v483_v5 = vpop.f32.mrf.mxu3 }
 0x2c4   :  { %v350_v34 = vpop.f32.mrf.mxu0  ;;  %v486_v6 = vpop.f32.mrf.mxu3 }
 0x2c5   :  { %906 = vmatpush.msk.msrb.mxu1 %vm110_vm0, %v350_v34  ;;  %v691_v34 = vld [vmem:[#allocation3 + $0x58] sm:$0xff] }
 0x2c7   :  { %371 = vmatpush.msrb.mxu1 %v347_v29  ;;  %v618_v29 = vld [vmem:[#allocation3 + $0x20] sm:$0xff] }
 0x2c8   :  { %907 = vmatmul.msk.f32.vlgmr.msrb.gmra.mxu1 %vm100_vm1, %v1205_v3 }
 0x2c9   :  { %598 = vmatpush.msra.mxu1 %v585_v18 }
 0x2cb   :  { %599 = vmatpush.msra.mxu1 %v584_v19 }
 0x2cc   :  { %v489_v7 = vpop.f32.mrf.mxu3 }
 0x2cd   :  { %600 = vmatpush.msra.mxu1 %v583_v20 }
 0x2cf   :  { %601 = vmatpush.msra.mxu1 %v582_v21 }
 0x2d0   :  { %908 = vmatmul.msk.f32.gmra.mxu1 %vm100_vm1, %v1239_v11 }
 0x2d8   :  { %909 = vmatmul.msk.f32.gmra.mxu1 %vm100_vm1, %v1253_v13 }
 0x2e0   :  { %922 = vmatmul.msk.f32.vlgmr.msra.gmra.mxu1 %vm183_vm2, %v1196_v2 }
 0x345   :  { %v373_v35 = vpop.f32.mrf.mxu1 }
 0x346   :  { %v393_v57 = vand.u32 2147483648, %v373_v35  ;;  %vm387_vm4 = vweird.f32 %v373_v35  ;;  %v391_v60 = vand.u32 2147483647, %v373_v35 }
 0x348   :  { %v394_v62 = vor.u32 1.1754944e-38, %v393_v57  ;;  %vm392_vm6 = vcmp.eq.f32.partialorder %v391_v60, 8.507059e+37  ;;  %v957_v57 = vld [vmem:[%s1446_s13] ss:$0 sm:$0xff] }
 0x34d   :  { %v376_v36 = vpop.f32.mrf.mxu1 }
 0x34e   :  { %969 = vrcp.f32 %v376_v36  ;;  %v408_v12 = vand.u32 2147483648, %v376_v36  ;;  %v406_v11 = vand.u32 2147483647, %v376_v36  ;;  %vm402_vm11 = vweird.f32 %v376_v36 }
 0x34f   :  { %971 = vrcp.f32 %v373_v35 }
 0x350   :  { %v409_v43 = vor.u32 1.1754944e-38, %v408_v12  ;;  %vm407_vm13 = vcmp.eq.f32.partialorder %v406_v11, 8.507059e+37  ;;  %v723_v12 = vld [vmem:[#allocation6 + $0x50] sm:$0xff]  ;;  %v722_v11 = vld [vmem:[#allocation6 + $0x48] sm:$0xff] }
 0x354   :  { %v970_v4 = vpop.eup %969 }
 0x355   :  { %v398_v37 = vmul.f32 %v970_v4, %v376_v36  ;;  %v379_v38 = vpop.f32.mrf.mxu1  ;;  %v972_v3 = vpop.eup %971  ;;  %vm403_vm10 = vweird.f32 %v970_v4  ;;  %v689_v36 = vld [vmem:[#allocation3 + $0x48] sm:$0xff] }
 0x356   :  { %973 = vrcp.f32 %v379_v38  ;;  %v383_v40 = vmul.f32 %v972_v3, %v373_v35  ;;  %vm404_vm12 = vmor %vm402_vm11, %vm403_vm10  ;;  %v423_v49 = vand.u32 2147483648, %v379_v38  ;;  %v421_v52 = vand.u32 2147483647, %v379_v38  ;;  %v690_v35 = vld [vmem:[#allocation3 + $0x50] sm:$0xff] }
 0x357   :  { %v399_v39 = vsub.f32 1.0, %v398_v37  ;;  %vm417_vm15 = vweird.f32 %v379_v38  ;;  %vm388_vm3 = vweird.f32 %v972_v3 }
 0x358   :  { %v384_v13 = vsub.f32 1.0, %v383_v40  ;;  %v424_v54 = vor.u32 1.1754944e-38, %v423_v49  ;;  %vm422_vm1 = vcmp.eq.f32.partialorder %v421_v52, 8.507059e+37  ;;  %vm389_vm5 = vmor %vm387_vm4, %vm388_vm3  ;;  %v955_v49 = vld [vmem:[%s1445_s12] ss:$0 sm:$0xff] }
 0x359   :  { %v400_v41 = vmul.f32 %v970_v4, %v399_v39  ;;  %v724_v39 = vld [vmem:[#allocation6 + $0x58] sm:$0xff] }
 0x35a   :  { %v385_v50 = vmul.f32 %v972_v3, %v384_v13  ;;  %742 = vmatpush.msrb.mxu1 %v724_v39  ;;  %v959_v39 = vld [vmem:[%s1445_s12 + $0x2] ss:$0 sm:$0xff] }
 0x35b   :  { %v401_v14 = vadd.f32 %v970_v4, %v400_v41 }
 0x35c   :  { %v974_v42 = vpop.eup %973  ;;  %v386_v56 = vadd.f32 %v972_v3, %v385_v50  ;;  %743 = vmatpush.msrb.mxu1 %v723_v12  ;;  %v956_v50 = vld [vmem:[%s1445_s12 + $0x1] ss:$0 sm:$0xff] }
 0x35d   :  { %v413_v44 = vmul.f32 %v974_v42, %v379_v38  ;;  %v405_v45 = vsel %vm404_vm12, %v970_v4, %v401_v14  ;;  %vm418_vm14 = vweird.f32 %v974_v42  ;;  %v688_v4 = vld [vmem:[#allocation3 + $0x40] sm:$0xff]  ;;  %v603_v52 = vpop.f32.mrf.mxu1 }
 0x35e   :  { %v410_v46 = vsel %vm407_vm13, %v409_v43, %v405_v45  ;;  %vm419_vm0 = vmor %vm417_vm15, %vm418_vm14  ;;  %v390_v61 = vsel %vm389_vm5, %v972_v3, %v386_v56  ;;  %v721_v43 = vld [vmem:[#allocation6 + $0x40] sm:$0xff]  ;;  %744 = vmatpush.msrb.mxu1 %v722_v11 }
 0x35f   :  { %v414_v47 = vsub.f32 1.0, %v413_v44  ;;  %v411_v48 = vmul.f32 %v966_v24, %v410_v46  ;;  %v395_v63 = vsel %vm392_vm6, %v394_v62, %v390_v61  ;;  %v547_v24 = vld [vmem:[#allocation3 + $0x10] sm:$0xff] }
 0x360   :  { %v396_v0 = vmul.f32 %v1321_v26, %v395_v63  ;;  %v546_v26 = vld [vmem:[#allocation3 + $0x8] sm:$0xff]  ;;  %745 = vmatpush.msrb.mxu1 %v721_v43 }
 0x361   :  { %v415_v51 = vmul.f32 %v974_v42, %v414_v47  ;;  %499 = vperm.xlu2 %952, %v411_v48   ;;  %934 = vmatmul.msk.f32.vlgmr.msrb.gmra.mxu1 %vm183_vm2, %v1196_v2  ;;  %v606_v48 = vpop.f32.mrf.mxu3 }
 0x363   :  { %v416_v53 = vadd.f32 %v974_v42, %v415_v51 }
 0x365   :  { %v420_v55 = vsel %vm419_vm0, %v974_v42, %v416_v53 }
 0x366   :  { %v425_v58 = vsel %vm422_vm1, %v424_v54, %v420_v55 }
 0x367   :  { %v426_v59 = vmul.f32 %v1311_v22, %v425_v58  ;;  %v548_v22 = vld [vmem:[#allocation3 + $0x18] sm:$0xff]  ;;  %v958_v58 = vld [vmem:[%s1446_s13 + $0x1] ss:$0 sm:$0xff] }
 0x368   :  { %571 = vmatpush.msra.mxu2 %v548_v22 }
 0x369   :  { %504 = vperm.xlu0 %950, %v426_v59   ;;  %935 = vmatmul.msk.f32.gmra.mxu1 %vm183_vm2, %v1191_v1 }
 0x36a   :  { %572 = vmatpush.msra.mxu2 %v547_v24 }
 0x36c   :  { %573 = vmatpush.msra.mxu2 %v546_v26 }
 0x36e   :  { %574 = vmatpush.msra.mxu2 %v545_v28 }
 0x370   :  { %709 = vmatpush.msrb.mxu2 %v691_v34 }
 0x371   :  { %494 = vperm.xlu0 %950, %v396_v0  }
 0x372   :  { %710 = vmatpush.msrb.mxu2 %v690_v35 }
 0x374   :  { %711 = vmatpush.msrb.mxu2 %v689_v36 }
 0x376   :  { %712 = vmatpush.msrb.mxu2 %v688_v4 }
 0x3bb   :  { %v500_v8 = vpop.permute.xlu2 %499 }
 0x3bc   :  { %v508_v15 = vmul.f32 %v500_v8, %v486_v6 }
 0x3db   :  { %v505_v9 = vpop.permute.xlu0 %504 }
 0x3dc   :  { %v509_v10 = vmul.f32 %v505_v9, %v489_v7 }
 0x3de   :  { %523 = vmatpush.msra.mxu0 %v509_v10  ;;  %v747_v28 = vpop.f32.mrf.mxu1 }
 0x3e0   :  { %524 = vmatpush.msra.mxu0 %v508_v15 }
 0x3e3   :  { %v495_v16 = vpop.permute.xlu0 %494 }
 0x3e4   :  { %v507_v17 = vmul.f32 %v495_v16, %v483_v5 }
 0x3e6   :  { %525 = vmatpush.msra.mxu0 %v507_v17 }
 0x3e7   :  { %916 = vmatmul.msk.f32.vlgmr.msra.gmra.mxu0 %vm323_vm9, %v1319_v25  ;;  %v620_v25 = vld [vmem:[#allocation3 + $0x30] sm:$0xff] }
 0x3e8   :  { %640 = vmatpush.msrb.mxu3 %v620_v25  ;;  %667 = vmatpush.msrb.mxu0 %v654_v30 }
 0x3ea   :  { %668 = vmatpush.msrb.mxu0 %v653_v31 }
 0x3ec   :  { %669 = vmatpush.msrb.mxu0 %v652_v32 }
 0x3ee   :  { %670 = vmatpush.msrb.mxu0 %v651_v33  ;;  %v960_v33 = vld [vmem:[%s1446_s13 + $0x2] ss:$0 sm:$0xff] }
 0x3ef   :  { %917 = vmatmul.msk.f32.gmra.mxu0 %vm323_vm9, %v1329_v27  ;;  %v619_v27 = vld [vmem:[#allocation3 + $0x28] sm:$0xff]  ;;  %v748_v12 = vadd.f32 %v960_v33, %v747_v28  ;;  %v962_v28 = vld [vmem:[%s1448_s15] ss:$0 sm:$0xff]  ;;  %s1082_s15 = smov [#allocation8]  }
 0x3f0   :  { %641 = vmatpush.msrb.mxu3 %v619_v27  ;;  %s870_s25 = sshll.u32 %s1082_s15, 4  ;;  %s871_s25 = int_to_ptr.vmem [resolvable:$true] %s870_s25 }
 0x3f2   :  { %642 = vmatpush.msrb.mxu3 %v618_v29 }
 0x3f7   :  { %927 = vmatmul.msk.f32.vlgmr.msrb.gmra.mxu0 %vm183_vm2, %v1196_v2 }
 0x3ff   :  { %928 = vmatmul.msk.f32.gmra.mxu0 %vm183_vm2, %v1191_v1 }
 0x464   :  { %v527_v37 = vpop.f32.mrf.mxu0 }
 0x465   :  { %v535_v38 = vmin.f32 %v527_v37, 0.0  ;;  %vm533_vm7 = vcmp.gt.f32.partialorder %v527_v37, 0.0 }
 0x467   :  { %v537_v3 = vmul.f32 1.442695, %v535_v38 }
 0x469   :  { %975 = vpow2.f32 %v537_v3 }
 0x46c   :  { %v530_v40 = vpop.f32.mrf.mxu0 }
 0x46d   :  { %v536_v41 = vmin.f32 %v530_v40, 0.0  ;;  %vm534_vm8 = vcmp.gt.f32.partialorder %v530_v40, 0.0 }
 0x46f   :  { %v976_v14 = vpop.eup %975  ;;  %v539_v42 = vmul.f32 1.442695, %v536_v41 }
 0x470   :  { %v918_v13 = vadd.f32 -1.0, %v976_v14 }
 0x471   :  { %977 = vpow2.f32 %v539_v42 }
 0x472   :  { %v543_v44 = vsel %vm533_vm7, %v527_v37, %v918_v13 }
 0x473   :  { %920 = vmatmul.msk.f32.vlgmr.msra.gmra.mxu2 %vm183_vm2, %v543_v44  ;;  %925 = vmatmul.msk.f32.vlgmr.msrb.gmra.mxu3 %vm183_vm2, %v543_v44 }
 0x474   :  { %v672_v51 = vpop.f32.mrf.mxu0 }
 0x477   :  { %v978_v45 = vpop.eup %977 }
 0x478   :  { %v919_v46 = vadd.f32 -1.0, %v978_v45 }
 0x47a   :  { %v544_v47 = vsel %vm534_vm8, %v530_v40, %v919_v46 }
 0x47b   :  { %921 = vmatmul.msk.f32.gmra.mxu2 %vm183_vm2, %v544_v47  ;;  %926 = vmatmul.msk.f32.gmra.mxu3 %vm183_vm2, %v544_v47 }
 0x47c   :  { %v675_v5 = vpop.f32.mrf.mxu0 }
 0x483   :  { %931 = vmatmul.msk.f32.vlgmr.msrb.gmra.mxu2 %vm183_vm2, %v543_v44 }
 0x48b   :  { %932 = vmatmul.msk.f32.gmra.mxu2 %vm183_vm2, %v544_v47 }
 0x4f6   :  { %v576_v53 = vpop.f32.mrf.mxu2  ;;  %v644_v54 = vpop.f32.mrf.mxu3 }
 0x4f7   :  { %v577_v55 = vadd.f32 %v955_v49, %v576_v53  ;;  %v645_v56 = vadd.f32 %v956_v50, %v644_v54 }
 0x4f9   :  { %v609_v59 = vadd.f32 %v603_v52, %v577_v55  ;;  %v678_v60 = vadd.f32 %v672_v51, %v645_v56 }
 0x4fb   :  { %v615_v61 = vadd.f32 %v957_v57, %v609_v59  ;;  %v685_v62 = vadd.f32 %v958_v58, %v678_v60 }
 0x4fd   :  { %v936_v63 = vmul.f32 -1.442695, %v615_v61  ;;  %v938_v0 = vmul.f32 -1.442695, %v685_v62 }
 0x4fe   :  { %v579_v6 = vpop.f32.mrf.mxu2  ;;  %v647_v7 = vpop.f32.mrf.mxu3 }
 0x4ff   :  { %979 = vpow2.f32 %v936_v63  ;;  %v580_v8 = vadd.f32 %v955_v49, %v579_v6  ;;  %v648_v9 = vadd.f32 %v956_v50, %v647_v7 }
 0x500   :  { %981 = vpow2.f32 %v938_v0 }
 0x501   :  { %v610_v10 = vadd.f32 %v606_v48, %v580_v8  ;;  %v679_v15 = vadd.f32 %v675_v5, %v648_v9  ;;  %v750_v48 = vpop.f32.mrf.mxu1 }
 0x502   :  { %v751_v59 = vadd.f32 %v960_v33, %v750_v48 }
 0x503   :  { %v616_v16 = vadd.f32 %v957_v57, %v610_v10  ;;  %v686_v17 = vadd.f32 %v958_v58, %v679_v15 }
 0x505   :  { %v980_v18 = vpop.eup %979  ;;  %v937_v19 = vmul.f32 -1.442695, %v616_v16  ;;  %v939_v22 = vmul.f32 -1.442695, %v686_v17 }
 0x506   :  { %v982_v20 = vpop.eup %981  ;;  %v759_v21 = vadd.f32 1.0, %v980_v18  ;;  %v714_v3 = vpop.f32.mrf.mxu2 }
 0x507   :  { %v797_v23 = vadd.f32 1.0, %v982_v20  ;;  %983 = vpow2.f32 %v937_v19  ;;  %v715_v46 = vadd.f32 %v959_v39, %v714_v3 }
 0x508   :  { %985 = vrcp.f32 %v759_v21  ;;  %v772_v36 = vand.u32 2147483648, %v759_v21  ;;  %v770_v37 = vand.u32 2147483647, %v759_v21  ;;  %vm766_vm10 = vweird.f32 %v759_v21 }
 0x509   :  { %987 = vrcp.f32 %v797_v23  ;;  %v810_v45 = vand.u32 2147483648, %v797_v23  ;;  %vm804_vm14 = vweird.f32 %v797_v23  ;;  %v808_v51 = vand.u32 2147483647, %v797_v23 }
 0x50a   :  { %989 = vpow2.f32 %v939_v22  ;;  %v773_v11 = vor.u32 1.1754944e-38, %v772_v36  ;;  %vm771_vm12 = vcmp.eq.f32.partialorder %v770_v37, 8.507059e+37 }
 0x50b   :  { %v811_v60 = vor.u32 1.1754944e-38, %v810_v45  ;;  %vm809_vm3 = vcmp.eq.f32.partialorder %v808_v51, 8.507059e+37 }
 0x50d   :  { %v984_v24 = vpop.eup %983 }
 0x50e   :  { %v986_v25 = vpop.eup %985  ;;  %v760_v26 = vadd.f32 1.0, %v984_v24  ;;  %v717_v63 = vpop.f32.mrf.mxu2 }
 0x50f   :  { %v988_v27 = vpop.eup %987  ;;  %v762_v29 = vmul.f32 %v986_v25, %v759_v21  ;;  %vm767_vm9 = vweird.f32 %v986_v25  ;;  %v718_v10 = vadd.f32 %v959_v39, %v717_v63 }
 0x510   :  { %v990_v30 = vpop.eup %989  ;;  %v800_v31 = vmul.f32 %v988_v27, %v797_v23  ;;  %991 = vrcp.f32 %v760_v26  ;;  %vm768_vm11 = vmor %vm766_vm10, %vm767_vm9  ;;  %vm805_vm13 = vweird.f32 %v988_v27  ;;  %v787_v52 = vand.u32 2147483648, %v760_v26 }
 0x511   :  { %v1386_v32 = vadd.f32 1.0, %v990_v30  ;;  %v763_v34 = vsub.f32 1.0, %v762_v29  ;;  %vm1396_vm15 = vmor %vm804_vm14, %vm805_vm13  ;;  %v785_v56 = vand.u32 2147483647, %v760_v26  ;;  %vm781_vm1 = vweird.f32 %v760_v26 }
 0x512   :  { %v801_v35 = vsub.f32 1.0, %v800_v31  ;;  %v788_v0 = vor.u32 1.1754944e-38, %v787_v52  ;;  %vm858_vm10 = vcmask 257024  }
 0x513   :  { %993 = vrcp.f32 %v1386_v32  ;;  %v764_v4 = vmul.f32 %v986_v25, %v763_v34  ;;  %vm786_vm5 = vcmp.eq.f32.partialorder %v785_v56, 8.507059e+37  ;;  %v825_v9 = vand.u32 2147483648, %v1386_v32 }
 0x514   :  { %v802_v38 = vmul.f32 %v988_v27, %v801_v35  ;;  %vm819_vm7 = vweird.f32 %v1386_v32  ;;  %v823_v17 = vand.u32 2147483647, %v1386_v32 }
 0x515   :  { %v765_v40 = vadd.f32 %v986_v25, %v764_v4  ;;  %v826_v23 = vor.u32 1.1754944e-38, %v825_v9 }
 0x516   :  { %v992_v41 = vpop.eup %991  ;;  %v803_v13 = vadd.f32 %v988_v27, %v802_v38  ;;  %vm824_vm9 = vcmp.eq.f32.partialorder %v823_v17, 8.507059e+37 }
 0x517   :  { %v769_v14 = vsel %vm768_vm11, %v986_v25, %v765_v40  ;;  %v777_v42 = vmul.f32 %v992_v41, %v760_v26  ;;  %vm782_vm0 = vweird.f32 %v992_v41  ;;  %v961_v25 = vld [vmem:[%s1447_s14] ss:$0 sm:$0xff] }
 0x518   :  { %v774_v43 = vsel %vm771_vm12, %v773_v11, %v769_v14  ;;  %v807_v58 = vsel %vm1396_vm15, %v988_v27, %v803_v13  ;;  %vm783_vm4 = vmor %vm781_vm1, %vm782_vm0 }
 0x519   :  { %v994_v44 = vpop.eup %993  ;;  %v829_v47 = vmul.f32 %v774_v43, %v748_v12  ;;  %v778_v49 = vsub.f32 1.0, %v777_v42  ;;  %v812_v5 = vsel %vm809_vm3, %v811_v60, %v807_v58 }
 0x51a   :  { %v815_v50 = vmul.f32 %v994_v44, %v1386_v32  ;;  %vm820_vm6 = vweird.f32 %v994_v44  ;;  %v835_v16 = vsub.f32 1.0, %v812_v5  ;;  %v839_v21 = vmul.f32 %v812_v5, %v1196_v2  ;;  %v860_v2 = vld [vmem:[%s1458_s24] sm:$0xff] }
 0x51b   :  { %v831_v54 = vadd.f32 %v829_v47, %v715_v46  ;;  %v779_v55 = vmul.f32 %v992_v41, %v778_v49  ;;  %vm821_vm8 = vmor %vm819_vm7, %vm820_vm6 }
 0x51c   :  { %v816_v57 = vsub.f32 1.0, %v815_v50 }
 0x51d   :  { %995 = vtanh.f32 %v831_v54  ;;  %v780_v61 = vadd.f32 %v992_v41, %v779_v55 }
 0x51e   :  { %v817_v62 = vmul.f32 %v994_v44, %v816_v57 }
 0x51f   :  { %v784_v6 = vsel %vm783_vm4, %v992_v41, %v780_v61 }
 0x520   :  { %v789_v7 = vsel %vm786_vm5, %v788_v0, %v784_v6  ;;  %v818_v8 = vadd.f32 %v994_v44, %v817_v62 }
 0x521   :  { %v830_v15 = vmul.f32 %v789_v7, %v751_v59 }
 0x522   :  { %v822_v22 = vsel %vm821_vm8, %v994_v44, %v818_v8 }
 0x523   :  { %v996_v18 = vpop.eup %995  ;;  %v832_v19 = vadd.f32 %v830_v15, %v718_v10  ;;  %v827_v26 = vsel %vm824_vm9, %v826_v23, %v822_v22 }
 0x524   :  { %v837_v20 = vmul.f32 %v996_v18, %v835_v16  ;;  %v836_v29 = vsub.f32 1.0, %v827_v26  ;;  %v840_v33 = vmul.f32 %v827_v26, %v1191_v1  ;;  %v861_v1 = vld [vmem:[%s1458_s24 + $0x8] sm:$0xf] }
 0x525   :  { %997 = vtanh.f32 %v832_v19 }
 0x526   :  { %v841_v24 = vadd.f32 %v839_v21, %v837_v20 }
 0x528   :  { %v843_v27 = vmax.f32 %v841_v24, 0.0 }
 0x52a   :  { %v849_v30 = vmul.f32 %v961_v25, %v843_v27 }
 0x52b   :  { %v998_v31 = vpop.eup %997 }
 0x52c   :  { %v838_v32 = vmul.f32 %v998_v31, %v836_v29  ;;  %v855_v34 = vadd.f32 %v962_v28, %v849_v30 }
 0x52e   :  { %v842_v35 = vadd.f32 %v840_v33, %v838_v32  ;;  %857 = vst.msk [vmem:[#allocation8] sm:$0xff] %vm183_vm2, %v855_v34  ;;  %v862_v36 = vadd.f32 %v860_v2, %v855_v34 }
 0x530   :  { %v844_v4 = vmax.f32 %v842_v35, 0.0  ;;  %864 = vst.msk [vmem:[%s1450_s17] sm:$0xff] %vm183_vm2, %v862_v36 }
 0x532   :  { %v850_v37 = vmul.f32 %v961_v25, %v844_v4 }
 0x534   :  { %v856_v38 = vadd.f32 %v962_v28, %v850_v37 }
 0x536   :  { %859 = vst.msk [vmem:[#allocation8 + $0x8] sm:$0xf] %vm858_vm10, %v856_v38  ;;  %v863_v3 = vadd.f32 %v861_v1, %v856_v38 }
 0x537   :  { %878 = dma.vmem_to_hbm [thread:$0]  %s871_s25, 256, %s873_s28, [#allocation5], %s1078_s1, %s1078_s1, %s1079_s20  }
 0x538   :  { %865 = vst.msk [vmem:[%s1450_s17 + $0x8] sm:$0xf] %vm858_vm10, %v863_v3 }
 0x539   :  { %1075 = dma.done.wait [#allocation5], 256  }
 0x53a   :  { %1076 = vsyncadd [#allocation5], 4294967040 }
 0x53b   :  { %887 = vsyncpa [#allocation4], 1 }
 0x53c   :  { %888 = vsyncpa [#allocation7], 1 }
 0x53d   :  { %889 = vsyncpa [#allocation5], 1 }

</bundles_post_ra>
